<compile_context>
chip_gen: v6e
topology: v6e:2x2x1
jax: 0.10.0
libtpu: 0.0.40
codegen_flags: <defaults>
</compile_context>

<pallas_src>
import functools

import jax
import jax.numpy as jnp
from jax.experimental import pallas as pl
from jax.experimental.pallas import tpu as pltpu

EPS = 1e-5     # torch.nn.LayerNorm default eps
LANE = 128     # TPU lane width


def _round_up(n, m):
    return ((n + m - 1) // m) * m


def _pad2d(a, rows, cols):
    return jnp.pad(a, ((0, rows - a.shape[0]), (0, cols - a.shape[1])))


def _bytes(shape, dtype):
    n = 1
    for d in shape:
        n *= int(d)
    return n * jnp.dtype(dtype).itemsize


# ----------------------------- fused kernel -----------------------------
def _layernorm_1pass(x, gamma, beta, n_valid):
    """LayerNorm over last dim. Padded lanes of x are zero; divide by true count."""
    inv_n = 1.0 / float(n_valid)
    s = jnp.sum(x, axis=-1, keepdims=True)
    s2 = jnp.sum(x * x, axis=-1, keepdims=True)
    mu = s * inv_n
    var = jnp.maximum(s2 * inv_n - mu * mu, 0.0)
    return (x - mu) * jax.lax.rsqrt(var + EPS) * gamma + beta


def _encode_block_kernel(layer_meta, *refs):
    """layer_meta: tuple of (cin, cout, cout_pad, tp_offset) per layer (static)."""
    num_layers = len(layer_meta)
    x_ref, t_ref, wt_all_ref = refs[0], refs[1], refs[2]
    w_refs = refs[3:3 + 8 * num_layers]
    o_ref = refs[3 + 8 * num_layers]

    mm_dtype = wt_all_ref.dtype  # bf16

    x = x_ref[...].astype(jnp.float32)                    # [TB, Cin_pad]
    t = t_ref[...].astype(mm_dtype)                       # [TB, T_pad]

    # All layers' time projections in a single MXU pass (biases folded into b1).
    tp_all = jnp.dot(t, wt_all_ref[...],
                     preferred_element_type=jnp.float32)  # [TB, sum(Cout_pad)]

    for l in range(num_layers):
        cin, cout, cout_pad, off = layer_meta[l]
        ln1_g, ln1_b, w1, b1t, ln2_g, ln2_b, w2, b2 = w_refs[8 * l:8 * l + 8]

        # LayerNorm(in_channel) + SiLU
        h = _layernorm_1pass(x, ln1_g[...], ln1_b[...], cin)
        h = h * jax.nn.sigmoid(h)

        # fc1 + time projection (bias b1t = b1 + bt, precomputed host-side)
        h = jnp.dot(h.astype(mm_dtype), w1[...],
                    preferred_element_type=jnp.float32)
        h = h + tp_all[:, off:off + cout_pad] + b1t[...]

        # LayerNorm(out_channel) + SiLU
        h = _layernorm_1pass(h, ln2_g[...], ln2_b[...], cout)
        h = h * jax.nn.sigmoid(h)

        # fc2
        x = jnp.dot(h.astype(mm_dtype), w2[...],
                    preferred_element_type=jnp.float32) + b2[...]

    o_ref[...] = x.astype(o_ref.dtype)


# -------------------------- host-side preparation --------------------------
def _prepare_params(layer_params, matmul_dtype=jnp.bfloat16):
    """Pad to 128-lane multiples, fold bt into b1, concat wt across layers."""
    prepped, wt_blocks, meta = [], [], []
    t_dim = layer_params[0]["wt"].shape[0]
    t_pad = _round_up(t_dim, LANE)
    offset = 0
    for p in layer_params:
        cin, cout = p["w1"].shape
        cin_p, cout_p = _round_up(cin, LANE), _round_up(cout, LANE)
        prepped.append({
            "ln1_g": _pad2d(p["ln1_g"], 1, cin_p),
            "ln1_b": _pad2d(p["ln1_b"], 1, cin_p),
            "w1": _pad2d(p["w1"], cin_p, cout_p).astype(matmul_dtype),
            "b1t": _pad2d(p["b1"] + p["bt"], 1, cout_p),
            "ln2_g": _pad2d(p["ln2_g"], 1, cout_p),
            "ln2_b": _pad2d(p["ln2_b"], 1, cout_p),
            "w2": _pad2d(p["w2"], cout_p, cout_p).astype(matmul_dtype),
            "b2": _pad2d(p["b2"], 1, cout_p),
        })
        wt_blocks.append(_pad2d(p["wt"], t_pad, cout_p).astype(matmul_dtype))
        meta.append((cin, cout, cout_p, offset))
        offset += cout_p
    return {
        "layers": prepped,
        "wt_all": jnp.concatenate(wt_blocks, axis=1),
        "meta": tuple(meta),
        "t_pad": t_pad,
        "cin0_pad": _round_up(layer_params[0]["w1"].shape[0], LANE),
    }


def encode_block_1d(sample, t_emb, layer_params, *, tile_b=256):
    """EncodeBlock1D.forward: all FCTimeEmbed layers fused into one pallas_call."""
    prep = _prepare_params(layer_params)
    meta = prep["meta"]
    cin0, cin0_p = sample.shape[1], prep["cin0_pad"]
    cout_last, cout_last_p = meta[-1][1], meta[-1][2]
    t_dim, t_p = t_emb.shape[1], prep["t_pad"]

    B = sample.shape[0]
    tile_b = min(tile_b, _round_up(B, 8))
    b_pad = _round_up(B, tile_b)

    x_p = jnp.pad(sample, ((0, b_pad - B), (0, cin0_p - cin0)))
    t_arr = jnp.pad(t_emb, ((0, b_pad - B), (0, t_p - t_dim)))

    weight_args = []
    for lp in prep["layers"]:
        weight_args += [lp["ln1_g"], lp["ln1_b"], lp["w1"], lp["b1t"],
                        lp["ln2_g"], lp["ln2_b"], lp["w2"], lp["b2"]]
    args = (x_p, t_arr, prep["wt_all"], *weight_args)

    in_specs = [
        pl.BlockSpec((tile_b, cin0_p), lambda i: (i, 0)),         # x tile
        pl.BlockSpec((tile_b, t_p), lambda i: (i, 0)),            # t_emb tile
        pl.BlockSpec(prep["wt_all"].shape, lambda i: (0, 0)),     # resident
    ]
    in_specs += [pl.BlockSpec(a.shape, lambda i: (0, 0)) for a in weight_args]
    out_specs = pl.BlockSpec((tile_b, cout_last_p), lambda i: (i, 0))

    # Explicit VMEM budget: double-buffered activation tiles + resident weights.
    block_bytes = (
        _bytes((tile_b, cin0_p), x_p.dtype)
        + _bytes((tile_b, t_p), t_arr.dtype)
        + _bytes((tile_b, cout_last_p), sample.dtype)
        + sum(_bytes(a.shape, a.dtype) for a in (prep["wt_all"], *weight_args))
    )
    vmem_limit = int(min(64 * 2**20, max(8 * 2**20, 2 * block_bytes + (2 << 20))))

    out_pad = pl.pallas_call(
        functools.partial(_encode_block_kernel, meta),
        out_shape=jax.ShapeDtypeStruct((b_pad, cout_last_p), sample.dtype),
        grid=(b_pad // tile_b,),
        in_specs=in_specs,
        out_specs=out_specs,
        compiler_params=pltpu.CompilerParams(
            dimension_semantics=("parallel",),
            vmem_limit_bytes=vmem_limit,
        ),
    )(*args)
    return out_pad[:B, :cout_last]


# -------------------- deterministic parameter construction --------------------
def init_fc_time_embed_params(key, in_ch, out_ch, temb_ch, dtype=jnp.float32):
    ks = jax.random.split(key, 6)
    scale = 0.02
    return {
        "ln1_g": jnp.ones((1, in_ch), dtype),
        "ln1_b": jnp.zeros((1, in_ch), dtype),
        "w1": (scale * jax.random.normal(ks[0], (in_ch, out_ch))).astype(dtype),
        "b1": (scale * jax.random.normal(ks[1], (1, out_ch))).astype(dtype),
        "wt": (scale * jax.random.normal(ks[2], (temb_ch, out_ch))).astype(dtype),
        "bt": (scale * jax.random.normal(ks[3], (1, out_ch))).astype(dtype),
        "ln2_g": jnp.ones((1, out_ch), dtype),
        "ln2_b": jnp.zeros((1, out_ch), dtype),
        "w2": (scale * jax.random.normal(ks[4], (out_ch, out_ch))).astype(dtype),
        "b2": (scale * jax.random.normal(ks[5], (1, out_ch))).astype(dtype),
    }


def init_encode_block_params(key, in_channels, out_channels, temb_channels,
                             num_layers, dtype=jnp.float32):
    params = []
    keys = jax.random.split(key, num_layers)
    for i in range(num_layers):
        if i < num_layers - 1:
            in_, out_ = in_channels, in_channels
        else:
            in_, out_ = in_channels, out_channels
        params.append(init_fc_time_embed_params(keys[i], in_, out_, temb_channels, dtype))
    return params


# -------------------- pure-JAX references (for correctness check) --------------------
def _layer_ref(x, t_emb, p, matmul_dtype=None):
    def ln(v, g, b):
        mu = jnp.mean(v, axis=-1, keepdims=True)
        var = jnp.mean((v - mu) ** 2, axis=-1, keepdims=True)
        return (v - mu) * jax.lax.rsqrt(var + EPS) * g + b

    def mm(a, w):
        if matmul_dtype is not None:
            a, w = a.astype(matmul_dtype), w.astype(matmul_dtype)
        return jnp.dot(a, w, preferred_element_type=jnp.float32)

    h = ln(x, p["ln1_g"], p["ln1_b"])
    h = h * jax.nn.sigmoid(h)
    h = mm(h, p["w1"]) + p["b1"]
    tp = mm(t_emb, p["wt"]) + p["bt"]
    h = h + tp
    h = ln(h, p["ln2_g"], p["ln2_b"])
    h = h * jax.nn.sigmoid(h)
    return mm(h, p["w2"]) + p["b2"]


def encode_block_ref(sample, t_emb, layer_params, matmul_dtype=None):
    for p in layer_params:
        sample = _layer_ref(sample, t_emb, p, matmul_dtype)
    return sample


if __name__ == "__main__":
    # Small shapes consistent with the module's forward:
    #   sample: [B, in_channels], t_emb: [B, temb_channels]
    B, in_channels, out_channels, temb_channels, num_layers = 8, 32, 64, 16, 3

    key = jax.random.PRNGKey(0)
    k_x, k_t, k_p = jax.random.split(key, 3)
    sample = jax.random.normal(k_x, (B, in_channels), jnp.float32)
    t_emb = jax.random.normal(k_t, (B, temb_channels), jnp.float32)
    params = init_encode_block_params(
        k_p, in_channels, out_channels, temb_channels, num_layers)

    out = jax.block_until_ready(encode_block_1d(sample, t_emb, params))
    assert out.shape == (B, out_channels)

    # Logic check vs a reference that matches the kernel's bf16-matmul precision.
    ref_bf16 = jax.block_until_ready(
        encode_block_ref(sample, t_emb, params, matmul_dtype=jnp.bfloat16))
    assert jnp.allclose(out, ref_bf16, atol=1e-3, rtol=1e-3), (
        float(jnp.max(jnp.abs(out - ref_bf16))))

    # Semantic check vs the full-f32 reference (looser tol due to bf16 matmuls).
    ref_f32 = jax.block_until_ready(encode_block_ref(sample, t_emb, params))
    assert jnp.allclose(out, ref_f32, atol=3e-2, rtol=3e-2), (
        float(jnp.max(jnp.abs(out - ref_f32))))

    print("KERNEL_OK")
</pallas_src>

<mosaic_0001>
module attributes {stable_mosaic.version = 11 : i64} {
  func.func @_encode_block_kernel(%arg0: i32, %arg1: memref<8x128xf32, #tpu.memory_space<vmem>>, %arg2: memref<8x128xf32, #tpu.memory_space<vmem>>, %arg3: memref<128x384xbf16, #tpu.memory_space<vmem>>, %arg4: memref<1x128xf32, #tpu.memory_space<vmem>>, %arg5: memref<1x128xf32, #tpu.memory_space<vmem>>, %arg6: memref<128x128xbf16, #tpu.memory_space<vmem>>, %arg7: memref<1x128xf32, #tpu.memory_space<vmem>>, %arg8: memref<1x128xf32, #tpu.memory_space<vmem>>, %arg9: memref<1x128xf32, #tpu.memory_space<vmem>>, %arg10: memref<128x128xbf16, #tpu.memory_space<vmem>>, %arg11: memref<1x128xf32, #tpu.memory_space<vmem>>, %arg12: memref<1x128xf32, #tpu.memory_space<vmem>>, %arg13: memref<1x128xf32, #tpu.memory_space<vmem>>, %arg14: memref<128x128xbf16, #tpu.memory_space<vmem>>, %arg15: memref<1x128xf32, #tpu.memory_space<vmem>>, %arg16: memref<1x128xf32, #tpu.memory_space<vmem>>, %arg17: memref<1x128xf32, #tpu.memory_space<vmem>>, %arg18: memref<128x128xbf16, #tpu.memory_space<vmem>>, %arg19: memref<1x128xf32, #tpu.memory_space<vmem>>, %arg20: memref<1x128xf32, #tpu.memory_space<vmem>>, %arg21: memref<1x128xf32, #tpu.memory_space<vmem>>, %arg22: memref<128x128xbf16, #tpu.memory_space<vmem>>, %arg23: memref<1x128xf32, #tpu.memory_space<vmem>>, %arg24: memref<1x128xf32, #tpu.memory_space<vmem>>, %arg25: memref<1x128xf32, #tpu.memory_space<vmem>>, %arg26: memref<128x128xbf16, #tpu.memory_space<vmem>>, %arg27: memref<1x128xf32, #tpu.memory_space<vmem>>, %arg28: memref<8x128xf32, #tpu.memory_space<vmem>>) attributes {dimension_semantics = [#tpu.dimension_semantics<parallel>], iteration_bounds = array<i64: 1>, scalar_prefetch = 0 : i64, scratch_operands = 0 : i64, tpu.core_type = #tpu.core_type<tc>, window_params = [{transform_indices = @transform_0, window_bounds = array<i64: 8, 128>}, {transform_indices = @transform_1, window_bounds = array<i64: 8, 128>}, {pipeline_mode = #tpu.pipeline_mode<synchronous>, transform_indices = @transform_2, window_bounds = array<i64: 128, 384>}, {pipeline_mode = #tpu.pipeline_mode<synchronous>, transform_indices = @transform_3, window_bounds = array<i64: 1, 128>}, {pipeline_mode = #tpu.pipeline_mode<synchronous>, transform_indices = @transform_4, window_bounds = array<i64: 1, 128>}, {pipeline_mode = #tpu.pipeline_mode<synchronous>, transform_indices = @transform_5, window_bounds = array<i64: 128, 128>}, {pipeline_mode = #tpu.pipeline_mode<synchronous>, transform_indices = @transform_6, window_bounds = array<i64: 1, 128>}, {pipeline_mode = #tpu.pipeline_mode<synchronous>, transform_indices = @transform_7, window_bounds = array<i64: 1, 128>}, {pipeline_mode = #tpu.pipeline_mode<synchronous>, transform_indices = @transform_8, window_bounds = array<i64: 1, 128>}, {pipeline_mode = #tpu.pipeline_mode<synchronous>, transform_indices = @transform_9, window_bounds = array<i64: 128, 128>}, {pipeline_mode = #tpu.pipeline_mode<synchronous>, transform_indices = @transform_10, window_bounds = array<i64: 1, 128>}, {pipeline_mode = #tpu.pipeline_mode<synchronous>, transform_indices = @transform_11, window_bounds = array<i64: 1, 128>}, {pipeline_mode = #tpu.pipeline_mode<synchronous>, transform_indices = @transform_12, window_bounds = array<i64: 1, 128>}, {pipeline_mode = #tpu.pipeline_mode<synchronous>, transform_indices = @transform_13, window_bounds = array<i64: 128, 128>}, {pipeline_mode = #tpu.pipeline_mode<synchronous>, transform_indices = @transform_14, window_bounds = array<i64: 1, 128>}, {pipeline_mode = #tpu.pipeline_mode<synchronous>, transform_indices = @transform_15, window_bounds = array<i64: 1, 128>}, {pipeline_mode = #tpu.pipeline_mode<synchronous>, transform_indices = @transform_16, window_bounds = array<i64: 1, 128>}, {pipeline_mode = #tpu.pipeline_mode<synchronous>, transform_indices = @transform_17, window_bounds = array<i64: 128, 128>}, {pipeline_mode = #tpu.pipeline_mode<synchronous>, transform_indices = @transform_18, window_bounds = array<i64: 1, 128>}, {pipeline_mode = #tpu.pipeline_mode<synchronous>, transform_indices = @transform_19, window_bounds = array<i64: 1, 128>}, {pipeline_mode = #tpu.pipeline_mode<synchronous>, transform_indices = @transform_20, window_bounds = array<i64: 1, 128>}, {pipeline_mode = #tpu.pipeline_mode<synchronous>, transform_indices = @transform_21, window_bounds = array<i64: 128, 128>}, {pipeline_mode = #tpu.pipeline_mode<synchronous>, transform_indices = @transform_22, window_bounds = array<i64: 1, 128>}, {pipeline_mode = #tpu.pipeline_mode<synchronous>, transform_indices = @transform_23, window_bounds = array<i64: 1, 128>}, {pipeline_mode = #tpu.pipeline_mode<synchronous>, transform_indices = @transform_24, window_bounds = array<i64: 1, 128>}, {pipeline_mode = #tpu.pipeline_mode<synchronous>, transform_indices = @transform_25, window_bounds = array<i64: 128, 128>}, {pipeline_mode = #tpu.pipeline_mode<synchronous>, transform_indices = @transform_26, window_bounds = array<i64: 1, 128>}, {transform_indices = @transform_27, window_bounds = array<i64: 8, 128>}]} {
    %c0 = arith.constant 0 : index
    %c0_0 = arith.constant 0 : index
    %0 = vector.load %arg1[%c0, %c0_0] : memref<8x128xf32, #tpu.memory_space<vmem>>, vector<8x128xf32>
    %c0_1 = arith.constant 0 : index
    %c0_2 = arith.constant 0 : index
    %1 = vector.load %arg2[%c0_1, %c0_2] : memref<8x128xf32, #tpu.memory_space<vmem>>, vector<8x128xf32>
    %2 = arith.truncf %1 : vector<8x128xf32> to vector<8x128xbf16>
    %c0_3 = arith.constant 0 : index
    %c0_4 = arith.constant 0 : index
    %3 = vector.load %arg3[%c0_3, %c0_4] : memref<128x384xbf16, #tpu.memory_space<vmem>>, vector<128x384xbf16>
    %cst = arith.constant dense<0.000000e+00> : vector<8x384xf32>
    %4 = tpu.matmul %2, %3, %cst {dimension_numbers = #tpu.dot_dimension_numbers<[1], [0], [0], [1], [0, 0, 1, 1], [], []>} : vector<8x128xbf16>, vector<128x384xbf16>, vector<8x384xf32> -> vector<8x384xf32>
    %c0_5 = arith.constant 0 : index
    %c0_6 = arith.constant 0 : index
    %5 = vector.load %arg4[%c0_5, %c0_6] : memref<1x128xf32, #tpu.memory_space<vmem>>, vector<1x128xf32>
    %c0_7 = arith.constant 0 : index
    %c0_8 = arith.constant 0 : index
    %6 = vector.load %arg5[%c0_7, %c0_8] : memref<1x128xf32, #tpu.memory_space<vmem>>, vector<1x128xf32>
    %cst_9 = arith.constant dense<0.000000e+00> : vector<8xf32>
    %7 = vector.multi_reduction <add>, %0, %cst_9 [1] : vector<8x128xf32> to vector<8xf32>
    %8 = vector.shape_cast %7 : vector<8xf32> to vector<8x1xf32>
    %9 = arith.mulf %0, %0 : vector<8x128xf32>
    %cst_10 = arith.constant dense<0.000000e+00> : vector<8xf32>
    %10 = vector.multi_reduction <add>, %9, %cst_10 [1] : vector<8x128xf32> to vector<8xf32>
    %11 = vector.shape_cast %10 : vector<8xf32> to vector<8x1xf32>
    %cst_11 = arith.constant 3.125000e-02 : f32
    %12 = vector.broadcast %cst_11 : f32 to vector<8x1xf32>
    %13 = arith.mulf %8, %12 : vector<8x1xf32>
    %cst_12 = arith.constant 3.125000e-02 : f32
    %14 = vector.broadcast %cst_12 : f32 to vector<8x1xf32>
    %15 = arith.mulf %11, %14 : vector<8x1xf32>
    %16 = arith.mulf %13, %13 : vector<8x1xf32>
    %17 = arith.subf %15, %16 : vector<8x1xf32>
    %cst_13 = arith.constant 0.000000e+00 : f32
    %18 = vector.broadcast %cst_13 : f32 to vector<8x1xf32>
    %19 = arith.maximumf %17, %18 : vector<8x1xf32>
    %20 = vector.broadcast %13 : vector<8x1xf32> to vector<8x128xf32>
    %21 = arith.subf %0, %20 : vector<8x128xf32>
    %cst_14 = arith.constant 9.99999974E-6 : f32
    %22 = vector.broadcast %cst_14 : f32 to vector<8x1xf32>
    %23 = arith.addf %19, %22 : vector<8x1xf32>
    %24 = math.rsqrt %23 : vector<8x1xf32>
    %25 = vector.broadcast %24 : vector<8x1xf32> to vector<8x128xf32>
    %26 = arith.mulf %21, %25 : vector<8x128xf32>
    %27 = vector.broadcast %5 : vector<1x128xf32> to vector<8x128xf32>
    %28 = arith.mulf %26, %27 : vector<8x128xf32>
    %29 = vector.broadcast %6 : vector<1x128xf32> to vector<8x128xf32>
    %30 = arith.addf %28, %29 : vector<8x128xf32>
    %31 = arith.negf %30 : vector<8x128xf32>
    %32 = math.exp %31 : vector<8x128xf32>
    %cst_15 = arith.constant 1.000000e+00 : f32
    %33 = vector.broadcast %cst_15 : f32 to vector<8x128xf32>
    %34 = arith.addf %33, %32 : vector<8x128xf32>
    %35 = arith.divf %33, %34 : vector<8x128xf32>
    %36 = arith.mulf %30, %35 : vector<8x128xf32>
    %37 = arith.truncf %36 : vector<8x128xf32> to vector<8x128xbf16>
    %c0_16 = arith.constant 0 : index
    %c0_17 = arith.constant 0 : index
    %38 = vector.load %arg6[%c0_16, %c0_17] : memref<128x128xbf16, #tpu.memory_space<vmem>>, vector<128x128xbf16>
    %cst_18 = arith.constant dense<0.000000e+00> : vector<8x128xf32>
    %39 = tpu.matmul %37, %38, %cst_18 {dimension_numbers = #tpu.dot_dimension_numbers<[1], [0], [0], [1], [0, 0, 1, 1], [], []>} : vector<8x128xbf16>, vector<128x128xbf16>, vector<8x128xf32> -> vector<8x128xf32>
    %40 = vector.extract_strided_slice %4 {offsets = [0, 0], sizes = [8, 128], strides = [1, 1]} : vector<8x384xf32> to vector<8x128xf32>
    %41 = arith.addf %39, %40 : vector<8x128xf32>
    %c0_19 = arith.constant 0 : index
    %c0_20 = arith.constant 0 : index
    %42 = vector.load %arg7[%c0_19, %c0_20] : memref<1x128xf32, #tpu.memory_space<vmem>>, vector<1x128xf32>
    %43 = vector.broadcast %42 : vector<1x128xf32> to vector<8x128xf32>
    %44 = arith.addf %41, %43 : vector<8x128xf32>
    %c0_21 = arith.constant 0 : index
    %c0_22 = arith.constant 0 : index
    %45 = vector.load %arg8[%c0_21, %c0_22] : memref<1x128xf32, #tpu.memory_space<vmem>>, vector<1x128xf32>
    %c0_23 = arith.constant 0 : index
    %c0_24 = arith.constant 0 : index
    %46 = vector.load %arg9[%c0_23, %c0_24] : memref<1x128xf32, #tpu.memory_space<vmem>>, vector<1x128xf32>
    %cst_25 = arith.constant dense<0.000000e+00> : vector<8xf32>
    %47 = vector.multi_reduction <add>, %44, %cst_25 [1] : vector<8x128xf32> to vector<8xf32>
    %48 = vector.shape_cast %47 : vector<8xf32> to vector<8x1xf32>
    %49 = arith.mulf %44, %44 : vector<8x128xf32>
    %cst_26 = arith.constant dense<0.000000e+00> : vector<8xf32>
    %50 = vector.multi_reduction <add>, %49, %cst_26 [1] : vector<8x128xf32> to vector<8xf32>
    %51 = vector.shape_cast %50 : vector<8xf32> to vector<8x1xf32>
    %cst_27 = arith.constant 3.125000e-02 : f32
    %52 = vector.broadcast %cst_27 : f32 to vector<8x1xf32>
    %53 = arith.mulf %48, %52 : vector<8x1xf32>
    %cst_28 = arith.constant 3.125000e-02 : f32
    %54 = vector.broadcast %cst_28 : f32 to vector<8x1xf32>
    %55 = arith.mulf %51, %54 : vector<8x1xf32>
    %56 = arith.mulf %53, %53 : vector<8x1xf32>
    %57 = arith.subf %55, %56 : vector<8x1xf32>
    %cst_29 = arith.constant 0.000000e+00 : f32
    %58 = vector.broadcast %cst_29 : f32 to vector<8x1xf32>
    %59 = arith.maximumf %57, %58 : vector<8x1xf32>
    %60 = vector.broadcast %53 : vector<8x1xf32> to vector<8x128xf32>
    %61 = arith.subf %44, %60 : vector<8x128xf32>
    %cst_30 = arith.constant 9.99999974E-6 : f32
    %62 = vector.broadcast %cst_30 : f32 to vector<8x1xf32>
    %63 = arith.addf %59, %62 : vector<8x1xf32>
    %64 = math.rsqrt %63 : vector<8x1xf32>
    %65 = vector.broadcast %64 : vector<8x1xf32> to vector<8x128xf32>
    %66 = arith.mulf %61, %65 : vector<8x128xf32>
    %67 = vector.broadcast %45 : vector<1x128xf32> to vector<8x128xf32>
    %68 = arith.mulf %66, %67 : vector<8x128xf32>
    %69 = vector.broadcast %46 : vector<1x128xf32> to vector<8x128xf32>
    %70 = arith.addf %68, %69 : vector<8x128xf32>
    %71 = arith.negf %70 : vector<8x128xf32>
    %72 = math.exp %71 : vector<8x128xf32>
    %cst_31 = arith.constant 1.000000e+00 : f32
    %73 = vector.broadcast %cst_31 : f32 to vector<8x128xf32>
    %74 = arith.addf %73, %72 : vector<8x128xf32>
    %75 = arith.divf %73, %74 : vector<8x128xf32>
    %76 = arith.mulf %70, %75 : vector<8x128xf32>
    %77 = arith.truncf %76 : vector<8x128xf32> to vector<8x128xbf16>
    %c0_32 = arith.constant 0 : index
    %c0_33 = arith.constant 0 : index
    %78 = vector.load %arg10[%c0_32, %c0_33] : memref<128x128xbf16, #tpu.memory_space<vmem>>, vector<128x128xbf16>
    %cst_34 = arith.constant dense<0.000000e+00> : vector<8x128xf32>
    %79 = tpu.matmul %77, %78, %cst_34 {dimension_numbers = #tpu.dot_dimension_numbers<[1], [0], [0], [1], [0, 0, 1, 1], [], []>} : vector<8x128xbf16>, vector<128x128xbf16>, vector<8x128xf32> -> vector<8x128xf32>
    %c0_35 = arith.constant 0 : index
    %c0_36 = arith.constant 0 : index
    %80 = vector.load %arg11[%c0_35, %c0_36] : memref<1x128xf32, #tpu.memory_space<vmem>>, vector<1x128xf32>
    %81 = vector.broadcast %80 : vector<1x128xf32> to vector<8x128xf32>
    %82 = arith.addf %79, %81 : vector<8x128xf32>
    %c0_37 = arith.constant 0 : index
    %c0_38 = arith.constant 0 : index
    %83 = vector.load %arg12[%c0_37, %c0_38] : memref<1x128xf32, #tpu.memory_space<vmem>>, vector<1x128xf32>
    %c0_39 = arith.constant 0 : index
    %c0_40 = arith.constant 0 : index
    %84 = vector.load %arg13[%c0_39, %c0_40] : memref<1x128xf32, #tpu.memory_space<vmem>>, vector<1x128xf32>
    %cst_41 = arith.constant dense<0.000000e+00> : vector<8xf32>
    %85 = vector.multi_reduction <add>, %82, %cst_41 [1] : vector<8x128xf32> to vector<8xf32>
    %86 = vector.shape_cast %85 : vector<8xf32> to vector<8x1xf32>
    %87 = arith.mulf %82, %82 : vector<8x128xf32>
    %cst_42 = arith.constant dense<0.000000e+00> : vector<8xf32>
    %88 = vector.multi_reduction <add>, %87, %cst_42 [1] : vector<8x128xf32> to vector<8xf32>
    %89 = vector.shape_cast %88 : vector<8xf32> to vector<8x1xf32>
    %cst_43 = arith.constant 3.125000e-02 : f32
    %90 = vector.broadcast %cst_43 : f32 to vector<8x1xf32>
    %91 = arith.mulf %86, %90 : vector<8x1xf32>
    %cst_44 = arith.constant 3.125000e-02 : f32
    %92 = vector.broadcast %cst_44 : f32 to vector<8x1xf32>
    %93 = arith.mulf %89, %92 : vector<8x1xf32>
    %94 = arith.mulf %91, %91 : vector<8x1xf32>
    %95 = arith.subf %93, %94 : vector<8x1xf32>
    %cst_45 = arith.constant 0.000000e+00 : f32
    %96 = vector.broadcast %cst_45 : f32 to vector<8x1xf32>
    %97 = arith.maximumf %95, %96 : vector<8x1xf32>
    %98 = vector.broadcast %91 : vector<8x1xf32> to vector<8x128xf32>
    %99 = arith.subf %82, %98 : vector<8x128xf32>
    %cst_46 = arith.constant 9.99999974E-6 : f32
    %100 = vector.broadcast %cst_46 : f32 to vector<8x1xf32>
    %101 = arith.addf %97, %100 : vector<8x1xf32>
    %102 = math.rsqrt %101 : vector<8x1xf32>
    %103 = vector.broadcast %102 : vector<8x1xf32> to vector<8x128xf32>
    %104 = arith.mulf %99, %103 : vector<8x128xf32>
    %105 = vector.broadcast %83 : vector<1x128xf32> to vector<8x128xf32>
    %106 = arith.mulf %104, %105 : vector<8x128xf32>
    %107 = vector.broadcast %84 : vector<1x128xf32> to vector<8x128xf32>
    %108 = arith.addf %106, %107 : vector<8x128xf32>
    %109 = arith.negf %108 : vector<8x128xf32>
    %110 = math.exp %109 : vector<8x128xf32>
    %cst_47 = arith.constant 1.000000e+00 : f32
    %111 = vector.broadcast %cst_47 : f32 to vector<8x128xf32>
    %112 = arith.addf %111, %110 : vector<8x128xf32>
    %113 = arith.divf %111, %112 : vector<8x128xf32>
    %114 = arith.mulf %108, %113 : vector<8x128xf32>
    %115 = arith.truncf %114 : vector<8x128xf32> to vector<8x128xbf16>
    %c0_48 = arith.constant 0 : index
    %c0_49 = arith.constant 0 : index
    %116 = vector.load %arg14[%c0_48, %c0_49] : memref<128x128xbf16, #tpu.memory_space<vmem>>, vector<128x128xbf16>
    %cst_50 = arith.constant dense<0.000000e+00> : vector<8x128xf32>
    %117 = tpu.matmul %115, %116, %cst_50 {dimension_numbers = #tpu.dot_dimension_numbers<[1], [0], [0], [1], [0, 0, 1, 1], [], []>} : vector<8x128xbf16>, vector<128x128xbf16>, vector<8x128xf32> -> vector<8x128xf32>
    %118 = vector.extract_strided_slice %4 {offsets = [0, 128], sizes = [8, 128], strides = [1, 1]} : vector<8x384xf32> to vector<8x128xf32>
    %119 = arith.addf %117, %118 : vector<8x128xf32>
    %c0_51 = arith.constant 0 : index
    %c0_52 = arith.constant 0 : index
    %120 = vector.load %arg15[%c0_51, %c0_52] : memref<1x128xf32, #tpu.memory_space<vmem>>, vector<1x128xf32>
    %121 = vector.broadcast %120 : vector<1x128xf32> to vector<8x128xf32>
    %122 = arith.addf %119, %121 : vector<8x128xf32>
    %c0_53 = arith.constant 0 : index
    %c0_54 = arith.constant 0 : index
    %123 = vector.load %arg16[%c0_53, %c0_54] : memref<1x128xf32, #tpu.memory_space<vmem>>, vector<1x128xf32>
    %c0_55 = arith.constant 0 : index
    %c0_56 = arith.constant 0 : index
    %124 = vector.load %arg17[%c0_55, %c0_56] : memref<1x128xf32, #tpu.memory_space<vmem>>, vector<1x128xf32>
    %cst_57 = arith.constant dense<0.000000e+00> : vector<8xf32>
    %125 = vector.multi_reduction <add>, %122, %cst_57 [1] : vector<8x128xf32> to vector<8xf32>
    %126 = vector.shape_cast %125 : vector<8xf32> to vector<8x1xf32>
    %127 = arith.mulf %122, %122 : vector<8x128xf32>
    %cst_58 = arith.constant dense<0.000000e+00> : vector<8xf32>
    %128 = vector.multi_reduction <add>, %127, %cst_58 [1] : vector<8x128xf32> to vector<8xf32>
    %129 = vector.shape_cast %128 : vector<8xf32> to vector<8x1xf32>
    %cst_59 = arith.constant 3.125000e-02 : f32
    %130 = vector.broadcast %cst_59 : f32 to vector<8x1xf32>
    %131 = arith.mulf %126, %130 : vector<8x1xf32>
    %cst_60 = arith.constant 3.125000e-02 : f32
    %132 = vector.broadcast %cst_60 : f32 to vector<8x1xf32>
    %133 = arith.mulf %129, %132 : vector<8x1xf32>
    %134 = arith.mulf %131, %131 : vector<8x1xf32>
    %135 = arith.subf %133, %134 : vector<8x1xf32>
    %cst_61 = arith.constant 0.000000e+00 : f32
    %136 = vector.broadcast %cst_61 : f32 to vector<8x1xf32>
    %137 = arith.maximumf %135, %136 : vector<8x1xf32>
    %138 = vector.broadcast %131 : vector<8x1xf32> to vector<8x128xf32>
    %139 = arith.subf %122, %138 : vector<8x128xf32>
    %cst_62 = arith.constant 9.99999974E-6 : f32
    %140 = vector.broadcast %cst_62 : f32 to vector<8x1xf32>
    %141 = arith.addf %137, %140 : vector<8x1xf32>
    %142 = math.rsqrt %141 : vector<8x1xf32>
    %143 = vector.broadcast %142 : vector<8x1xf32> to vector<8x128xf32>
    %144 = arith.mulf %139, %143 : vector<8x128xf32>
    %145 = vector.broadcast %123 : vector<1x128xf32> to vector<8x128xf32>
    %146 = arith.mulf %144, %145 : vector<8x128xf32>
    %147 = vector.broadcast %124 : vector<1x128xf32> to vector<8x128xf32>
    %148 = arith.addf %146, %147 : vector<8x128xf32>
    %149 = arith.negf %148 : vector<8x128xf32>
    %150 = math.exp %149 : vector<8x128xf32>
    %cst_63 = arith.constant 1.000000e+00 : f32
    %151 = vector.broadcast %cst_63 : f32 to vector<8x128xf32>
    %152 = arith.addf %151, %150 : vector<8x128xf32>
    %153 = arith.divf %151, %152 : vector<8x128xf32>
    %154 = arith.mulf %148, %153 : vector<8x128xf32>
    %155 = arith.truncf %154 : vector<8x128xf32> to vector<8x128xbf16>
    %c0_64 = arith.constant 0 : index
    %c0_65 = arith.constant 0 : index
    %156 = vector.load %arg18[%c0_64, %c0_65] : memref<128x128xbf16, #tpu.memory_space<vmem>>, vector<128x128xbf16>
    %cst_66 = arith.constant dense<0.000000e+00> : vector<8x128xf32>
    %157 = tpu.matmul %155, %156, %cst_66 {dimension_numbers = #tpu.dot_dimension_numbers<[1], [0], [0], [1], [0, 0, 1, 1], [], []>} : vector<8x128xbf16>, vector<128x128xbf16>, vector<8x128xf32> -> vector<8x128xf32>
    %c0_67 = arith.constant 0 : index
    %c0_68 = arith.constant 0 : index
    %158 = vector.load %arg19[%c0_67, %c0_68] : memref<1x128xf32, #tpu.memory_space<vmem>>, vector<1x128xf32>
    %159 = vector.broadcast %158 : vector<1x128xf32> to vector<8x128xf32>
    %160 = arith.addf %157, %159 : vector<8x128xf32>
    %c0_69 = arith.constant 0 : index
    %c0_70 = arith.constant 0 : index
    %161 = vector.load %arg20[%c0_69, %c0_70] : memref<1x128xf32, #tpu.memory_space<vmem>>, vector<1x128xf32>
    %c0_71 = arith.constant 0 : index
    %c0_72 = arith.constant 0 : index
    %162 = vector.load %arg21[%c0_71, %c0_72] : memref<1x128xf32, #tpu.memory_space<vmem>>, vector<1x128xf32>
    %cst_73 = arith.constant dense<0.000000e+00> : vector<8xf32>
    %163 = vector.multi_reduction <add>, %160, %cst_73 [1] : vector<8x128xf32> to vector<8xf32>
    %164 = vector.shape_cast %163 : vector<8xf32> to vector<8x1xf32>
    %165 = arith.mulf %160, %160 : vector<8x128xf32>
    %cst_74 = arith.constant dense<0.000000e+00> : vector<8xf32>
    %166 = vector.multi_reduction <add>, %165, %cst_74 [1] : vector<8x128xf32> to vector<8xf32>
    %167 = vector.shape_cast %166 : vector<8xf32> to vector<8x1xf32>
    %cst_75 = arith.constant 3.125000e-02 : f32
    %168 = vector.broadcast %cst_75 : f32 to vector<8x1xf32>
    %169 = arith.mulf %164, %168 : vector<8x1xf32>
    %cst_76 = arith.constant 3.125000e-02 : f32
    %170 = vector.broadcast %cst_76 : f32 to vector<8x1xf32>
    %171 = arith.mulf %167, %170 : vector<8x1xf32>
    %172 = arith.mulf %169, %169 : vector<8x1xf32>
    %173 = arith.subf %171, %172 : vector<8x1xf32>
    %cst_77 = arith.constant 0.000000e+00 : f32
    %174 = vector.broadcast %cst_77 : f32 to vector<8x1xf32>
    %175 = arith.maximumf %173, %174 : vector<8x1xf32>
    %176 = vector.broadcast %169 : vector<8x1xf32> to vector<8x128xf32>
    %177 = arith.subf %160, %176 : vector<8x128xf32>
    %cst_78 = arith.constant 9.99999974E-6 : f32
    %178 = vector.broadcast %cst_78 : f32 to vector<8x1xf32>
    %179 = arith.addf %175, %178 : vector<8x1xf32>
    %180 = math.rsqrt %179 : vector<8x1xf32>
    %181 = vector.broadcast %180 : vector<8x1xf32> to vector<8x128xf32>
    %182 = arith.mulf %177, %181 : vector<8x128xf32>
    %183 = vector.broadcast %161 : vector<1x128xf32> to vector<8x128xf32>
    %184 = arith.mulf %182, %183 : vector<8x128xf32>
    %185 = vector.broadcast %162 : vector<1x128xf32> to vector<8x128xf32>
    %186 = arith.addf %184, %185 : vector<8x128xf32>
    %187 = arith.negf %186 : vector<8x128xf32>
    %188 = math.exp %187 : vector<8x128xf32>
    %cst_79 = arith.constant 1.000000e+00 : f32
    %189 = vector.broadcast %cst_79 : f32 to vector<8x128xf32>
    %190 = arith.addf %189, %188 : vector<8x128xf32>
    %191 = arith.divf %189, %190 : vector<8x128xf32>
    %192 = arith.mulf %186, %191 : vector<8x128xf32>
    %193 = arith.truncf %192 : vector<8x128xf32> to vector<8x128xbf16>
    %c0_80 = arith.constant 0 : index
    %c0_81 = arith.constant 0 : index
    %194 = vector.load %arg22[%c0_80, %c0_81] : memref<128x128xbf16, #tpu.memory_space<vmem>>, vector<128x128xbf16>
    %cst_82 = arith.constant dense<0.000000e+00> : vector<8x128xf32>
    %195 = tpu.matmul %193, %194, %cst_82 {dimension_numbers = #tpu.dot_dimension_numbers<[1], [0], [0], [1], [0, 0, 1, 1], [], []>} : vector<8x128xbf16>, vector<128x128xbf16>, vector<8x128xf32> -> vector<8x128xf32>
    %196 = vector.extract_strided_slice %4 {offsets = [0, 256], sizes = [8, 128], strides = [1, 1]} : vector<8x384xf32> to vector<8x128xf32>
    %197 = arith.addf %195, %196 : vector<8x128xf32>
    %c0_83 = arith.constant 0 : index
    %c0_84 = arith.constant 0 : index
    %198 = vector.load %arg23[%c0_83, %c0_84] : memref<1x128xf32, #tpu.memory_space<vmem>>, vector<1x128xf32>
    %199 = vector.broadcast %198 : vector<1x128xf32> to vector<8x128xf32>
    %200 = arith.addf %197, %199 : vector<8x128xf32>
    %c0_85 = arith.constant 0 : index
    %c0_86 = arith.constant 0 : index
    %201 = vector.load %arg24[%c0_85, %c0_86] : memref<1x128xf32, #tpu.memory_space<vmem>>, vector<1x128xf32>
    %c0_87 = arith.constant 0 : index
    %c0_88 = arith.constant 0 : index
    %202 = vector.load %arg25[%c0_87, %c0_88] : memref<1x128xf32, #tpu.memory_space<vmem>>, vector<1x128xf32>
    %cst_89 = arith.constant dense<0.000000e+00> : vector<8xf32>
    %203 = vector.multi_reduction <add>, %200, %cst_89 [1] : vector<8x128xf32> to vector<8xf32>
    %204 = vector.shape_cast %203 : vector<8xf32> to vector<8x1xf32>
    %205 = arith.mulf %200, %200 : vector<8x128xf32>
    %cst_90 = arith.constant dense<0.000000e+00> : vector<8xf32>
    %206 = vector.multi_reduction <add>, %205, %cst_90 [1] : vector<8x128xf32> to vector<8xf32>
    %207 = vector.shape_cast %206 : vector<8xf32> to vector<8x1xf32>
    %cst_91 = arith.constant 1.562500e-02 : f32
    %208 = vector.broadcast %cst_91 : f32 to vector<8x1xf32>
    %209 = arith.mulf %204, %208 : vector<8x1xf32>
    %cst_92 = arith.constant 1.562500e-02 : f32
    %210 = vector.broadcast %cst_92 : f32 to vector<8x1xf32>
    %211 = arith.mulf %207, %210 : vector<8x1xf32>
    %212 = arith.mulf %209, %209 : vector<8x1xf32>
    %213 = arith.subf %211, %212 : vector<8x1xf32>
    %cst_93 = arith.constant 0.000000e+00 : f32
    %214 = vector.broadcast %cst_93 : f32 to vector<8x1xf32>
    %215 = arith.maximumf %213, %214 : vector<8x1xf32>
    %216 = vector.broadcast %209 : vector<8x1xf32> to vector<8x128xf32>
    %217 = arith.subf %200, %216 : vector<8x128xf32>
    %cst_94 = arith.constant 9.99999974E-6 : f32
    %218 = vector.broadcast %cst_94 : f32 to vector<8x1xf32>
    %219 = arith.addf %215, %218 : vector<8x1xf32>
    %220 = math.rsqrt %219 : vector<8x1xf32>
    %221 = vector.broadcast %220 : vector<8x1xf32> to vector<8x128xf32>
    %222 = arith.mulf %217, %221 : vector<8x128xf32>
    %223 = vector.broadcast %201 : vector<1x128xf32> to vector<8x128xf32>
    %224 = arith.mulf %222, %223 : vector<8x128xf32>
    %225 = vector.broadcast %202 : vector<1x128xf32> to vector<8x128xf32>
    %226 = arith.addf %224, %225 : vector<8x128xf32>
    %227 = arith.negf %226 : vector<8x128xf32>
    %228 = math.exp %227 : vector<8x128xf32>
    %cst_95 = arith.constant 1.000000e+00 : f32
    %229 = vector.broadcast %cst_95 : f32 to vector<8x128xf32>
    %230 = arith.addf %229, %228 : vector<8x128xf32>
    %231 = arith.divf %229, %230 : vector<8x128xf32>
    %232 = arith.mulf %226, %231 : vector<8x128xf32>
    %233 = arith.truncf %232 : vector<8x128xf32> to vector<8x128xbf16>
    %c0_96 = arith.constant 0 : index
    %c0_97 = arith.constant 0 : index
    %234 = vector.load %arg26[%c0_96, %c0_97] : memref<128x128xbf16, #tpu.memory_space<vmem>>, vector<128x128xbf16>
    %cst_98 = arith.constant dense<0.000000e+00> : vector<8x128xf32>
    %235 = tpu.matmul %233, %234, %cst_98 {dimension_numbers = #tpu.dot_dimension_numbers<[1], [0], [0], [1], [0, 0, 1, 1], [], []>} : vector<8x128xbf16>, vector<128x128xbf16>, vector<8x128xf32> -> vector<8x128xf32>
    %c0_99 = arith.constant 0 : index
    %c0_100 = arith.constant 0 : index
    %236 = vector.load %arg27[%c0_99, %c0_100] : memref<1x128xf32, #tpu.memory_space<vmem>>, vector<1x128xf32>
    %237 = vector.broadcast %236 : vector<1x128xf32> to vector<8x128xf32>
    %238 = arith.addf %235, %237 : vector<8x128xf32>
    %c0_101 = arith.constant 0 : index
    %c0_102 = arith.constant 0 : index
    %239 = vector.load %arg28[%c0_101, %c0_102] : memref<8x128xf32, #tpu.memory_space<vmem>>, vector<8x128xf32>
    tpu.vector_store %arg28[%c0_101, %c0_102], %238 {strides = array<i32>} : memref<8x128xf32, #tpu.memory_space<vmem>>, vector<8x128xf32>,
    return
  }
  func.func @transform_0(%arg0: i32) -> (i32, i32) {
    %c0_i32 = arith.constant 0 : i32
    %c0_i32_0 = arith.constant 0 : i32
    return %arg0, %c0_i32 : i32, i32
  }
  func.func @transform_1(%arg0: i32) -> (i32, i32) {
    %c0_i32 = arith.constant 0 : i32
    %c0_i32_0 = arith.constant 0 : i32
    return %arg0, %c0_i32 : i32, i32
  }
  func.func @transform_2(%arg0: i32) -> (i32, i32) {
    %c0_i32 = arith.constant 0 : i32
    %c0_i32_0 = arith.constant 0 : i32
    %c0_i32_1 = arith.constant 0 : i32
    return %c0_i32, %c0_i32_0 : i32, i32
  }
  func.func @transform_3(%arg0: i32) -> (i32, i32) {
    %c0_i32 = arith.constant 0 : i32
    %c0_i32_0 = arith.constant 0 : i32
    %c0_i32_1 = arith.constant 0 : i32
    return %c0_i32, %c0_i32_0 : i32, i32
  }
  func.func @transform_4(%arg0: i32) -> (i32, i32) {
    %c0_i32 = arith.constant 0 : i32
    %c0_i32_0 = arith.constant 0 : i32
    %c0_i32_1 = arith.constant 0 : i32
    return %c0_i32, %c0_i32_0 : i32, i32
  }
  func.func @transform_5(%arg0: i32) -> (i32, i32) {
    %c0_i32 = arith.constant 0 : i32
    %c0_i32_0 = arith.constant 0 : i32
    %c0_i32_1 = arith.constant 0 : i32
    return %c0_i32, %c0_i32_0 : i32, i32
  }
  func.func @transform_6(%arg0: i32) -> (i32, i32) {
    %c0_i32 = arith.constant 0 : i32
    %c0_i32_0 = arith.constant 0 : i32
    %c0_i32_1 = arith.constant 0 : i32
    return %c0_i32, %c0_i32_0 : i32, i32
  }
  func.func @transform_7(%arg0: i32) -> (i32, i32) {
    %c0_i32 = arith.constant 0 : i32
    %c0_i32_0 = arith.constant 0 : i32
    %c0_i32_1 = arith.constant 0 : i32
    return %c0_i32, %c0_i32_0 : i32, i32
  }
  func.func @transform_8(%arg0: i32) -> (i32, i32) {
    %c0_i32 = arith.constant 0 : i32
    %c0_i32_0 = arith.constant 0 : i32
    %c0_i32_1 = arith.constant 0 : i32
    return %c0_i32, %c0_i32_0 : i32, i32
  }
  func.func @transform_9(%arg0: i32) -> (i32, i32) {
    %c0_i32 = arith.constant 0 : i32
    %c0_i32_0 = arith.constant 0 : i32
    %c0_i32_1 = arith.constant 0 : i32
    return %c0_i32, %c0_i32_0 : i32, i32
  }
  func.func @transform_10(%arg0: i32) -> (i32, i32) {
    %c0_i32 = arith.constant 0 : i32
    %c0_i32_0 = arith.constant 0 : i32
    %c0_i32_1 = arith.constant 0 : i32
    return %c0_i32, %c0_i32_0 : i32, i32
  }
  func.func @transform_11(%arg0: i32) -> (i32, i32) {
    %c0_i32 = arith.constant 0 : i32
    %c0_i32_0 = arith.constant 0 : i32
    %c0_i32_1 = arith.constant 0 : i32
    return %c0_i32, %c0_i32_0 : i32, i32
  }
  func.func @transform_12(%arg0: i32) -> (i32, i32) {
    %c0_i32 = arith.constant 0 : i32
    %c0_i32_0 = arith.constant 0 : i32
    %c0_i32_1 = arith.constant 0 : i32
    return %c0_i32, %c0_i32_0 : i32, i32
  }
  func.func @transform_13(%arg0: i32) -> (i32, i32) {
    %c0_i32 = arith.constant 0 : i32
    %c0_i32_0 = arith.constant 0 : i32
    %c0_i32_1 = arith.constant 0 : i32
    return %c0_i32, %c0_i32_0 : i32, i32
  }
  func.func @transform_14(%arg0: i32) -> (i32, i32) {
    %c0_i32 = arith.constant 0 : i32
    %c0_i32_0 = arith.constant 0 : i32
    %c0_i32_1 = arith.constant 0 : i32
    return %c0_i32, %c0_i32_0 : i32, i32
  }
  func.func @transform_15(%arg0: i32) -> (i32, i32) {
    %c0_i32 = arith.constant 0 : i32
    %c0_i32_0 = arith.constant 0 : i32
    %c0_i32_1 = arith.constant 0 : i32
    return %c0_i32, %c0_i32_0 : i32, i32
  }
  func.func @transform_16(%arg0: i32) -> (i32, i32) {
    %c0_i32 = arith.constant 0 : i32
    %c0_i32_0 = arith.constant 0 : i32
    %c0_i32_1 = arith.constant 0 : i32
    return %c0_i32, %c0_i32_0 : i32, i32
  }
  func.func @transform_17(%arg0: i32) -> (i32, i32) {
    %c0_i32 = arith.constant 0 : i32
    %c0_i32_0 = arith.constant 0 : i32
    %c0_i32_1 = arith.constant 0 : i32
    return %c0_i32, %c0_i32_0 : i32, i32
  }
  func.func @transform_18(%arg0: i32) -> (i32, i32) {
    %c0_i32 = arith.constant 0 : i32
    %c0_i32_0 = arith.constant 0 : i32
    %c0_i32_1 = arith.constant 0 : i32
    return %c0_i32, %c0_i32_0 : i32, i32
  }
  func.func @transform_19(%arg0: i32) -> (i32, i32) {
    %c0_i32 = arith.constant 0 : i32
    %c0_i32_0 = arith.constant 0 : i32
    %c0_i32_1 = arith.constant 0 : i32
    return %c0_i32, %c0_i32_0 : i32, i32
  }
  func.func @transform_20(%arg0: i32) -> (i32, i32) {
    %c0_i32 = arith.constant 0 : i32
    %c0_i32_0 = arith.constant 0 : i32
    %c0_i32_1 = arith.constant 0 : i32
    return %c0_i32, %c0_i32_0 : i32, i32
  }
  func.func @transform_21(%arg0: i32) -> (i32, i32) {
    %c0_i32 = arith.constant 0 : i32
    %c0_i32_0 = arith.constant 0 : i32
    %c0_i32_1 = arith.constant 0 : i32
    return %c0_i32, %c0_i32_0 : i32, i32
  }
  func.func @transform_22(%arg0: i32) -> (i32, i32) {
    %c0_i32 = arith.constant 0 : i32
    %c0_i32_0 = arith.constant 0 : i32
    %c0_i32_1 = arith.constant 0 : i32
    return %c0_i32, %c0_i32_0 : i32, i32
  }
  func.func @transform_23(%arg0: i32) -> (i32, i32) {
    %c0_i32 = arith.constant 0 : i32
    %c0_i32_0 = arith.constant 0 : i32
    %c0_i32_1 = arith.constant 0 : i32
    return %c0_i32, %c0_i32_0 : i32, i32
  }
  func.func @transform_24(%arg0: i32) -> (i32, i32) {
    %c0_i32 = arith.constant 0 : i32
    %c0_i32_0 = arith.constant 0 : i32
    %c0_i32_1 = arith.constant 0 : i32
    return %c0_i32, %c0_i32_0 : i32, i32
  }
  func.func @transform_25(%arg0: i32) -> (i32, i32) {
    %c0_i32 = arith.constant 0 : i32
    %c0_i32_0 = arith.constant 0 : i32
    %c0_i32_1 = arith.constant 0 : i32
    return %c0_i32, %c0_i32_0 : i32, i32
  }
  func.func @transform_26(%arg0: i32) -> (i32, i32) {
    %c0_i32 = arith.constant 0 : i32
    %c0_i32_0 = arith.constant 0 : i32
    %c0_i32_1 = arith.constant 0 : i32
    return %c0_i32, %c0_i32_0 : i32, i32
  }
  func.func @transform_27(%arg0: i32) -> (i32, i32) {
    %c0_i32 = arith.constant 0 : i32
    %c0_i32_0 = arith.constant 0 : i32
    return %arg0, %c0_i32 : i32, i32
  }
}

</mosaic_0001>

<bundles_post_ra>
// kernel: tpu_custom_call.1
= control target key start
LH: loop header
LB: loop body
LE: loop exit
PB: predicated region body
PF: predicated region fallthrough
CT: control target
= control target key end

     0   :  { %s2362_s0 = inlined_call_operand.hbm [shape: f32[8,128], index: 0, kind: input, shape index: {}]   ;;  %s2363_s1 = inlined_call_operand.hbm [shape: f32[8,128], index: 1, kind: input, shape index: {}]   ;;  %s2364_s2 = inlined_call_operand.hbm [shape: bf16[128,384], index: 2, kind: input, shape index: {}]   ;;  %s2365_s3 = inlined_call_operand.vmem [shape: f32[1,128], index: 3, kind: input, shape index: {}]   ;;  %s2366_s4 = inlined_call_operand.vmem [shape: f32[1,128], index: 4, kind: input, shape index: {}]   ;;  %s2367_s5 = inlined_call_operand.hbm [shape: bf16[128,128], index: 5, kind: input, shape index: {}]   ;;  %s2368_s6 = inlined_call_operand.vmem [shape: f32[1,128], index: 6, kind: input, shape index: {}]   ;;  %s2369_s7 = inlined_call_operand.vmem [shape: f32[1,128], index: 7, kind: input, shape index: {}]   ;;  %s2370_s8 = inlined_call_operand.vmem [shape: f32[1,128], index: 8, kind: input, shape index: {}]   ;;  %s2371_s9 = inlined_call_operand.hbm [shape: bf16[128,128], index: 9, kind: input, shape index: {}]   ;;  %s2372_s10 = inlined_call_operand.vmem [shape: f32[1,128], index: 10, kind: input, shape index: {}]   ;;  %s2373_s11 = inlined_call_operand.vmem [shape: f32[1,128], index: 11, kind: input, shape index: {}]   ;;  %s2374_s12 = inlined_call_operand.vmem [shape: f32[1,128], index: 12, kind: input, shape index: {}]   ;;  %s2375_s13 = inlined_call_operand.hbm [shape: bf16[128,128], index: 13, kind: input, shape index: {}]   ;;  %s2376_s14 = inlined_call_operand.vmem [shape: f32[1,128], index: 14, kind: input, shape index: {}]   ;;  %s2377_s15 = inlined_call_operand.vmem [shape: f32[1,128], index: 15, kind: input, shape index: {}]   ;;  %s2378_s16 = inlined_call_operand.vmem [shape: f32[1,128], index: 16, kind: input, shape index: {}]   ;;  %s2379_s17 = inlined_call_operand.hbm [shape: bf16[128,128], index: 17, kind: input, shape index: {}]   ;;  %s2380_s18 = inlined_call_operand.vmem [shape: f32[1,128], index: 18, kind: input, shape index: {}]   ;;  %s2381_s19 = inlined_call_operand.vmem [shape: f32[1,128], index: 19, kind: input, shape index: {}]   ;;  %s2382_s20 = inlined_call_operand.vmem [shape: f32[1,128], index: 20, kind: input, shape index: {}]   ;;  %s2383_s21 = inlined_call_operand.hbm [shape: bf16[128,128], index: 21, kind: input, shape index: {}]   ;;  %s2384_s22 = inlined_call_operand.vmem [shape: f32[1,128], index: 22, kind: input, shape index: {}]   ;;  %s2385_s23 = inlined_call_operand.vmem [shape: f32[1,128], index: 23, kind: input, shape index: {}]   ;;  %s2386_s24 = inlined_call_operand.vmem [shape: f32[1,128], index: 24, kind: input, shape index: {}]   ;;  %s2387_s25 = inlined_call_operand.hbm [shape: bf16[128,128], index: 25, kind: input, shape index: {}]   ;;  %s2388_s26 = inlined_call_operand.vmem [shape: f32[1,128], index: 26, kind: input, shape index: {}]   ;;  %s2389_s27 = inlined_call_operand.hbm [shape: f32[8,128], index: 27, kind: output, shape index: {}]  }
   0x1   :  { %2390 = sst [smem:[#allocation24_spill]] %s2362_s0 }
   0x2   :  { %2391 = sst [smem:[#allocation25_spill]] %s2363_s1 }
   0x3   :  { %2392 = sst [smem:[#allocation26_spill]] %s2364_s2 }
   0x4   :  { %2393 = sst [smem:[#allocation27_spill]] %s2365_s3 }
   0x5   :  { %2394 = sst [smem:[#allocation28_spill]] %s2366_s4 }
   0x6   :  { %2395 = sst [smem:[#allocation29_spill]] %s2367_s5 }
   0x7   :  { %2396 = sst [smem:[#allocation30_spill]] %s2368_s6 }
   0x8   :  { %2397 = sst [smem:[#allocation31_spill]] %s2369_s7 }
   0x9   :  { %2398 = sst [smem:[#allocation32_spill]] %s2370_s8 }
   0xa   :  { %2399 = sst [smem:[#allocation33_spill]] %s2371_s9 }
   0xb   :  { %2400 = sst [smem:[#allocation34_spill]] %s2372_s10 }
   0xc   :  { %2401 = sst [smem:[#allocation35_spill]] %s2373_s11 }
   0xd   :  { %32 = vsyncpa [#allocation3], 0 }
   0xe   :  { %33 = vsyncpa [#allocation6], 0 }
   0xf   :  { %34 = vsyncpa [#allocation9], 0 }
  0x10   :  { %35 = vsyncpa [#allocation12], 0 }
  0x11   :  { %36 = vsyncpa [#allocation15], 0 }
  0x12   :  { %37 = vsyncpa [#allocation4], 0  ;;  %s2011_s7 = smov [#allocation5]   ;;  %s2012_s8 = smov [#allocation8]  }
  0x13   :  { %s54_s4 = sshll.u32 %s2011_s7, 4  ;;  %s79_s30 = sshll.u32 %s2012_s8, 4  ;;  %s55_s4 = int_to_ptr.vmem [resolvable:$true] %s54_s4  ;;  %s80_s30 = int_to_ptr.vmem [resolvable:$true] %s79_s30 }
  0x14   :  { %s1807_s9 = scalar_lea.vmem %s55_s4, 128  ;;  %p1812_p1 = scmp.lt.s32.totalorder %s55_s4, %s55_s4 }
  0x15   :  { %p1808_p0 = scmp.ne.s32.totalorder %s55_s4, %s1807_s9  ;;  %p1813_p2 = scmp.lt.s32.totalorder %s1807_s9, %s1807_s9 }
  0x17   :  { %p1814_p3 = por %p1813_p2, %p1812_p1 }
  0x19   :  { %p1815_p4 = pnand %p1814_p3, %p1808_p0 }
  0x1b   :  { %1818 = shalt.err (!%p1815_p4)
}
  0x1c   :  { %s2402_s0 = sld [smem:[#allocation25_spill]]  ;;  %s1827_s10 = scalar_lea.vmem %s80_s30, 1024 }
  0x1d   :  { %p1828_p5 = scmp.ne.s32.totalorder %s80_s30, %s1827_s10  ;;  %p1832_p6 = scmp.lt.s32.totalorder %s80_s30, %s80_s30 }
  0x1e   :  { %p1833_p7 = scmp.lt.s32.totalorder %s1827_s10, %s1827_s10 }
  0x20   :  { %p1834_p8 = por %p1833_p7, %p1832_p6 }
  0x22   :  { %57 = dma.hbm_to_vmem [thread:$0]  %s2402_s0, 128, %s55_s4, [#allocation6]  }
  0x23   :  { %p1835_p9 = pnand %p1834_p8, %p1828_p5 }
  0x25   :  { %1838 = shalt.err (!%p1835_p9)
}
  0x26   :  { %s2013_s29 = smov 64   ;;  %s2014_s1 = smov 4  }
  0x27   :  { %s2403_s2 = sld [smem:[#allocation29_spill]]  ;;  %s2015_s3 = smov [#allocation11]  }
  0x28   :  { %s115_s7 = sshll.u32 %s2015_s3, 4  ;;  %s2016_s8 = smov [#allocation14]   ;;  %s116_s7 = int_to_ptr.vmem [resolvable:$true] %s115_s7 }
  0x29   :  { %s151_s4 = sshll.u32 %s2016_s8, 4  ;;  %s1847_s9 = scalar_lea.vmem %s116_s7, 1024  ;;  %s152_s4 = int_to_ptr.vmem [resolvable:$true] %s151_s4 }
  0x2a   :  { %p1848_p10 = scmp.ne.s32.totalorder %s116_s7, %s1847_s9  ;;  %p1852_p11 = scmp.lt.s32.totalorder %s116_s7, %s116_s7 }
  0x2b   :  { %p1853_p12 = scmp.lt.s32.totalorder %s1847_s9, %s1847_s9 }
  0x2d   :  { %85 = dma.hbm_to_vmem [thread:$0]  %s2403_s2, 1024, %s80_s30, [#allocation9], %s2013_s29, %s2013_s29, %s2014_s1  }
  0x2e   :  { %p1854_p13 = por %p1853_p12, %p1852_p11 }
  0x30   :  { %p1855_p0 = pnand %p1854_p13, %p1848_p10 }
  0x32   :  { %1858 = shalt.err (!%p1855_p0)
}
  0x33   :  { %121 = dma.hbm_to_vmem [thread:$0]  %s2375_s13, 1024, %s116_s7, [#allocation12], %s2013_s29, %s2013_s29, %s2014_s1  }
  0x34   :  { %s1867_s30 = scalar_lea.vmem %s152_s4, 1024  ;;  %p1872_p2 = scmp.lt.s32.totalorder %s152_s4, %s152_s4 }
  0x35   :  { %p1868_p1 = scmp.ne.s32.totalorder %s152_s4, %s1867_s30  ;;  %p1873_p3 = scmp.lt.s32.totalorder %s1867_s30, %s1867_s30 }
  0x37   :  { %p1874_p4 = por %p1873_p3, %p1872_p2 }
  0x39   :  { %p1875_p5 = pnand %p1874_p4, %p1868_p1 }
  0x3b   :  { %1878 = shalt.err (!%p1875_p5)
}
  0x3c   :  { %157 = dma.hbm_to_vmem [thread:$0]  %s2383_s21, 1024, %s152_s4, [#allocation15], %s2013_s29, %s2013_s29, %s2014_s1  }
  0x3d   :  { %s2017_s6 = smov [#allocation2]   ;;  %s2018_s2 = smov [#allocation7]  }
  0x3e   :  { %s44_s11 = sshll.u32 %s2017_s6, 4  ;;  %s63_s3 = sshll.u32 %s2018_s2, 4  ;;  %s45_s11 = int_to_ptr.vmem [resolvable:$true] %s44_s11  ;;  %s64_s3 = int_to_ptr.vmem [resolvable:$true] %s63_s3 }
  0x3f   :  { %s1887_s13 = scalar_lea.vmem %s45_s11, 128  ;;  %p1892_p7 = scmp.lt.s32.totalorder %s45_s11, %s45_s11 }
  0x40   :  { %p1888_p6 = scmp.ne.s32.totalorder %s45_s11, %s1887_s13  ;;  %p1893_p8 = scmp.lt.s32.totalorder %s1887_s13, %s1887_s13 }
  0x42   :  { %p1894_p9 = por %p1893_p8, %p1892_p7 }
  0x44   :  { %p1895_p10 = pnand %p1894_p9, %p1888_p6 }
  0x46   :  { %1898 = shalt.err (!%p1895_p10)
}
  0x47   :  { %s2404_s9 = sld [smem:[#allocation24_spill]]  ;;  %s1907_s5 = scalar_lea.vmem %s64_s3, 3072 }
  0x48   :  { %p1908_p11 = scmp.ne.s32.totalorder %s64_s3, %s1907_s5  ;;  %p1912_p12 = scmp.lt.s32.totalorder %s64_s3, %s64_s3 }
  0x49   :  { %p1913_p13 = scmp.lt.s32.totalorder %s1907_s5, %s1907_s5 }
  0x4b   :  { %p1914_p0 = por %p1913_p13, %p1912_p12 }
  0x4d   :  { %47 = dma.hbm_to_vmem [thread:$0]  %s2404_s9, 128, %s45_s11, [#allocation3]  }
  0x4e   :  { %p1915_p1 = pnand %p1914_p0, %p1908_p11 }
  0x50   :  { %1918 = shalt.err (!%p1915_p1)
}
  0x51   :  { %s2019_s21 = smov 192   ;;  %s2020_s4 = smov 12  }
  0x52   :  { %s2405_s0 = sld [smem:[#allocation26_spill]]  ;;  %s2021_s10 = smov [#allocation10]  }
  0x53   :  { %s97_s6 = sshll.u32 %s2021_s10, 4  ;;  %s2022_s2 = smov [#allocation13]   ;;  %s98_s6 = int_to_ptr.vmem [resolvable:$true] %s97_s6 }
  0x54   :  { %s133_s13 = sshll.u32 %s2022_s2, 4  ;;  %s1927_s11 = scalar_lea.vmem %s98_s6, 1024  ;;  %s134_s13 = int_to_ptr.vmem [resolvable:$true] %s133_s13 }
  0x55   :  { %p1928_p2 = scmp.ne.s32.totalorder %s98_s6, %s1927_s11  ;;  %p1932_p3 = scmp.lt.s32.totalorder %s98_s6, %s98_s6 }
  0x56   :  { %p1933_p4 = scmp.lt.s32.totalorder %s1927_s11, %s1927_s11 }
  0x58   :  { %69 = dma.hbm_to_vmem [thread:$0]  %s2405_s0, 3072, %s64_s3, [#allocation6], %s2019_s21, %s2019_s21, %s2020_s4  }
  0x59   :  { %p1934_p5 = por %p1933_p4, %p1932_p3 }
  0x5b   :  { %p1935_p6 = pnand %p1934_p5, %p1928_p2 }
  0x5d   :  { %1938 = shalt.err (!%p1935_p6)
}
  0x5e   :  { %s2406_s9 = sld [smem:[#allocation33_spill]]  ;;  %s1947_s3 = scalar_lea.vmem %s134_s13, 1024 }
  0x5f   :  { %p1948_p7 = scmp.ne.s32.totalorder %s134_s13, %s1947_s3  ;;  %p1952_p8 = scmp.lt.s32.totalorder %s134_s13, %s134_s13 }
  0x60   :  { %p1953_p9 = scmp.lt.s32.totalorder %s1947_s3, %s1947_s3 }
  0x62   :  { %p1954_p10 = por %p1953_p9, %p1952_p8 }
  0x64   :  { %103 = dma.hbm_to_vmem [thread:$0]  %s2406_s9, 1024, %s98_s6, [#allocation9], %s2013_s29, %s2013_s29, %s2014_s1  }
  0x65   :  { %p1955_p11 = pnand %p1954_p10, %p1948_p7 }
  0x67   :  { %1958 = shalt.err (!%p1955_p11)
}
  0x68   :  { %139 = dma.hbm_to_vmem [thread:$0]  %s2379_s17, 1024, %s134_s13, [#allocation12], %s2013_s29, %s2013_s29, %s2014_s1  }
  0x69   :  { %s2023_s4 = smov [#allocation16]  }
  0x6a   :  { %s169_s28 = sshll.u32 %s2023_s4, 4  ;;  %s170_s28 = int_to_ptr.vmem [resolvable:$true] %s169_s28 }
  0x6b   :  { %s1967_s30 = scalar_lea.vmem %s170_s28, 1024  ;;  %p1972_p13 = scmp.lt.s32.totalorder %s170_s28, %s170_s28 }
  0x6c   :  { %p1968_p12 = scmp.ne.s32.totalorder %s170_s28, %s1967_s30  ;;  %p1973_p0 = scmp.lt.s32.totalorder %s1967_s30, %s1967_s30 }
  0x6e   :  { %p1974_p1 = por %p1973_p0, %p1972_p13 }
  0x70   :  { %p1975_p2 = pnand %p1974_p1, %p1968_p12 }
  0x72   :  { %1978 = shalt.err (!%p1975_p2)
}
  0x73   :  { %175 = dma.hbm_to_vmem [thread:$0]  %s2387_s25, 1024, %s170_s28, [#allocation15], %s2013_s29, %s2013_s29, %s2014_s1  }
  0x74   :  { %1999 = dma.done.wait [#allocation3], 128  }
  0x75   :  { %2000 = vsyncadd [#allocation3], 4294967168 }
  0x76   :  { %2001 = dma.done.wait [#allocation6], 3200  }
  0x77   :  { %2002 = vsyncadd [#allocation6], 4294964096 }
  0x78   :  { %2003 = dma.done.wait [#allocation9], 2048  }
  0x79   :  { %2004 = vsyncadd [#allocation9], 4294965248 }
  0x7a   :  { %2005 = dma.done.wait [#allocation12], 2048  }
  0x7b   :  { %2006 = vsyncadd [#allocation12], 4294965248 }
  0x7c   :  { %2007 = dma.done.wait [#allocation15], 2048  }
  0x7d   :  { %2008 = vsyncadd [#allocation15], 4294965248  ;;  %v2213_v0 = vld [vmem:[#allocation2] sm:$0xff]  ;;  %v1683_v2 = vld [vmem:[#allocation7 + $0xac] ss:$12 sps:$4 sm:$0xff]   ;;  %v2024_v13 = vmov 0  }
  0x7e   :  { %452 = vadd.xlane.f32.xlu0 %v2213_v0  ;;  %v454_v1 = vmul.f32 %v2213_v0, %v2213_v0  ;;  %369 = vmatprep.subr.bf16.mxu0 %v1683_v2  ;;  %v1685_v3 = vld [vmem:[#allocation7 + $0xa8] ss:$12 sps:$4 sm:$0xff]   ;;  %v1688_v5 = vld [vmem:[#allocation7 + $0x90] ss:$12 sps:$4 sm:$0xff]   ;;  %v1691_v7 = vld [vmem:[#allocation7 + $0x78] ss:$12 sps:$4 sm:$0xff]  }
  0x7f   :  { %370 = vmatpush1.bf16.msra.mxu0 %v1685_v3  ;;  %v1686_v4 = vld [vmem:[#allocation7 + $0x94] ss:$12 sps:$4 sm:$0xff]   ;;  %v1689_v6 = vld [vmem:[#allocation7 + $0x7c] ss:$12 sps:$4 sm:$0xff]   ;;  %v1692_v8 = vld [vmem:[#allocation7 + $0x64] ss:$12 sps:$4 sm:$0xff]   ;;  %401 = vmatprep.mubr.bf16.mxu0 %v2024_v13 }
  0x80   :  { %371 = vmatprep.subr.bf16.mxu0 %v1686_v4  ;;  %v1694_v9 = vld [vmem:[#allocation7 + $0x60] ss:$12 sps:$4 sm:$0xff]   ;;  %v1697_v11 = vld [vmem:[#allocation7 + $0x48] ss:$12 sps:$4 sm:$0xff]   ;;  %v1700_v14 = vld [vmem:[#allocation7 + $0x30] ss:$12 sps:$4 sm:$0xff]  }
  0x81   :  { %v1695_v10 = vld [vmem:[#allocation7 + $0x4c] ss:$12 sps:$4 sm:$0xff]   ;;  %v1698_v12 = vld [vmem:[#allocation7 + $0x34] ss:$12 sps:$4 sm:$0xff]   ;;  %v2025_v15 = vmov 0.0   ;;  %vm2026_vm0 = vmmov 0  }
  0x82   :  { %455 = vadd.xlane.f32.xlu0 %v454_v1  ;;  %1526 = vmatprep.subr.bf16.mxu1 %v2025_v15  ;;  %v1701_v16 = vld [vmem:[#allocation7 + $0x1c] ss:$12 sps:$4 sm:$0xff]   ;;  %v1703_v17 = vld [vmem:[#allocation7 + $0x18] ss:$12 sps:$4 sm:$0xff]   ;;  %v1706_v19 = vld [vmem:[#allocation7] ss:$12 sps:$4 sm:$0xff]  }
  0x83   :  { %372 = vmatpush1.bf16.msra.mxu0 %v1688_v5  ;;  %1542 = vmatprep.mubr.msk.bf16.mxu1 %vm2026_vm0, %v2025_v15  ;;  %v1704_v18 = vld [vmem:[#allocation7 + $0x4] ss:$12 sps:$4 sm:$0xff]   ;;  %v207_v20 = vld [vmem:[#allocation5] sm:$0xff]  ;;  %v1709_v24 = vld [vmem:[#allocation8 + $0x28] sm:$0xff]   ;;  %s2407_s29 = sld [smem:[#allocation27_spill]] }
  0x84   :  { %373 = vmatprep.subr.bf16.mxu0 %v1689_v6  ;;  %v1707_v21 = vld [vmem:[#allocation8 + $0x38] sm:$0xff]   ;;  %v2221_v22 = vpack.c.bf16 %v207_v20, %v207_v20  ;;  %v1708_v23 = vld [vmem:[#allocation8 + $0x30] sm:$0xff]   ;;  %v1710_v25 = vld [vmem:[#allocation8 + $0x20] sm:$0xff]   ;;  %s2408_s2 = sld [smem:[#allocation28_spill]] }
  0x85   :  { %v1711_v26 = vld [vmem:[#allocation8 + $0x18] sm:$0xff]   ;;  %v1712_v27 = vld [vmem:[#allocation8 + $0x10] sm:$0xff]   ;;  %v1713_v28 = vld [vmem:[#allocation8 + $0x8] sm:$0xff]   ;;  %s2409_s7 = sld [smem:[#allocation30_spill]] }
  0x86   :  { %v1714_v29 = vld [vmem:[#allocation8] sm:$0xff]   ;;  %v1715_v63 = vld [vmem:[#allocation7 + $0xb0] ss:$12 sps:$4 sm:$0xff]   ;;  %v1718_v2 = vld [vmem:[#allocation7 + $0x68] ss:$12 sps:$4 sm:$0xff]   ;;  %s2410_s3 = sld [smem:[#allocation31_spill]] }
  0x87   :  { %374 = vmatpush1.bf16.msra.mxu0 %v1691_v7  ;;  %1527 = vmatpush3.bf16.msra.mxu1 %v1715_v63  ;;  %v1717_v1 = vld [vmem:[#allocation7 + $0x80] ss:$12 sps:$4 sm:$0xff]   ;;  %v1719_v3 = vld [vmem:[#allocation7 + $0x50] ss:$12 sps:$4 sm:$0xff]   ;;  %v1720_v4 = vld [vmem:[#allocation7 + $0x38] ss:$12 sps:$4 sm:$0xff]  }
  0x88   :  { %375 = vmatprep.subr.bf16.mxu0 %v1692_v8  ;;  %1528 = vmatprep.subr.bf16.mxu1 %v2025_v15  ;;  %v1721_v5 = vld [vmem:[#allocation7 + $0x20] ss:$12 sps:$4 sm:$0xff]   ;;  %v1722_v6 = vld [vmem:[#allocation7 + $0x8] ss:$12 sps:$4 sm:$0xff]   ;;  %v1723_v7 = vld [vmem:[#allocation10 + $0x38] sm:$0xff]   ;;  %s2411_s4 = sld [smem:[#allocation32_spill]] }
  0x89   :  { %v1391_v40 = vld [vmem:[%s2407_s29] ss:$0 sm:$0xff]  ;;  %v1729_v13 = vld [vmem:[#allocation10 + $0x8] sm:$0xff]   ;;  %s2412_s0 = sld [smem:[#allocation34_spill]] }
  0x8a   :  { %v1392_v42 = vld [vmem:[%s2408_s2] ss:$0 sm:$0xff]  ;;  %s2413_s25 = sld [smem:[#allocation35_spill]] }
  0x8b   :  { %376 = vmatpush1.bf16.msra.mxu0 %v1694_v9  ;;  %v1402_v56 = vld [vmem:[%s2409_s7] ss:$0 sm:$0xff]  ;;  %v1725_v9 = vld [vmem:[#allocation10 + $0x28] sm:$0xff]  }
  0x8c   :  { %377 = vmatprep.subr.bf16.mxu0 %v1695_v10  ;;  %v1724_v8 = vld [vmem:[#allocation10 + $0x30] sm:$0xff]   ;;  %v1726_v10 = vld [vmem:[#allocation10 + $0x20] sm:$0xff]  }
  0x8f   :  { %378 = vmatpush1.bf16.msra.mxu0 %v1697_v11  ;;  %v1727_v11 = vld [vmem:[#allocation10 + $0x18] sm:$0xff]  }
  0x90   :  { %379 = vmatprep.subr.bf16.mxu0 %v1698_v12  ;;  %v1728_v12 = vld [vmem:[#allocation10 + $0x10] sm:$0xff]  }
  0x93   :  { %380 = vmatpush1.bf16.msra.mxu0 %v1700_v14  ;;  %v1730_v14 = vld [vmem:[#allocation10] sm:$0xff]  }
  0x94   :  { %381 = vmatprep.subr.bf16.mxu0 %v1701_v16 }
  0x97   :  { %382 = vmatpush1.bf16.msra.mxu0 %v1703_v17 }
  0x98   :  { %383 = vmatprep.subr.bf16.mxu0 %v1704_v18 }
  0x9b   :  { %384 = vmatpush1.bf16.msra.mxu0 %v1706_v19 }
  0x9c   :  { %1546 = vmatprep.subr.bf16.mxu0 %v2025_v15 }
  0x9e   :  { %402 = vmatmul.mubr.bf16.vlgmr.msra.gmra.mxu0 %v2221_v22 }
  0x9f   :  { %1547 = vmatpush3.bf16.msra.mxu0 %v1707_v21  ;;  %1562 = vmatprep.mubr.msk.bf16.mxu0 %vm2026_vm0, %v2025_v15 }
  0xa0   :  { %1548 = vmatprep.subr.bf16.mxu0 %v2025_v15 }
  0xa3   :  { %1549 = vmatpush3.bf16.msra.mxu0 %v1708_v23 }
  0xa4   :  { %1550 = vmatprep.subr.bf16.mxu0 %v2025_v15 }
  0xa7   :  { %1551 = vmatpush3.bf16.msra.mxu0 %v1709_v24 }
  0xa8   :  { %1552 = vmatprep.subr.bf16.mxu0 %v2025_v15 }
  0xab   :  { %1553 = vmatpush3.bf16.msra.mxu0 %v1710_v25 }
  0xac   :  { %1554 = vmatprep.subr.bf16.mxu0 %v2025_v15 }
  0xaf   :  { %1555 = vmatpush3.bf16.msra.mxu0 %v1711_v26  ;;  %v1403_v26 = vld [vmem:[%s2410_s3] ss:$0 sm:$0xff] }
  0xb0   :  { %1556 = vmatprep.subr.bf16.mxu0 %v2025_v15 }
  0xb3   :  { %1557 = vmatpush3.bf16.msra.mxu0 %v1712_v27 }
  0xb4   :  { %1558 = vmatprep.subr.bf16.mxu0 %v2025_v15 }
  0xb7   :  { %1559 = vmatpush3.bf16.msra.mxu0 %v1713_v28  ;;  %v1404_v28 = vld [vmem:[%s2411_s4] ss:$0 sm:$0xff] }
  0xb8   :  { %1560 = vmatprep.subr.bf16.mxu0 %v2025_v15 }
  0xbb   :  { %1561 = vmatpush3.bf16.msra.mxu0 %v1714_v29 }
  0xbc   :  { %1586 = vmatprep.subr.bf16.mxu0 %v2025_v15 }
 0x107   :  { %v453_v30 = vpop.xlane.xlu0 %452 }
 0x108   :  { %v457_v31 = vmul.f32 0.03125, %v453_v30 }
 0x10a   :  { %v459_v33 = vmul.f32 %v457_v31, %v457_v31  ;;  %v462_v38 = vsub.f32 %v2213_v0, %v457_v31  ;;  %v1716_v0 = vld [vmem:[#allocation7 + $0x98] ss:$12 sps:$4 sm:$0xff]  }
 0x10b   :  { %v456_v32 = vpop.xlane.xlu0 %455  ;;  %1529 = vmatpush3.bf16.msra.mxu1 %v1716_v0 }
 0x10c   :  { %v458_v34 = vmul.f32 0.03125, %v456_v32  ;;  %1530 = vmatprep.subr.bf16.mxu1 %v2025_v15 }
 0x10e   :  { %v460_v35 = vsub.f32 %v458_v34, %v459_v33 }
 0x10f   :  { %1531 = vmatpush3.bf16.msra.mxu1 %v1717_v1 }
 0x110   :  { %v461_v36 = vmax.f32 %v460_v35, 0.0  ;;  %1532 = vmatprep.subr.bf16.mxu1 %v2025_v15 }
 0x112   :  { %v463_v37 = vadd.f32 1e-05, %v461_v36 }
 0x113   :  { %1533 = vmatpush3.bf16.msra.mxu1 %v1718_v2 }
 0x114   :  { %1763 = vrsqrt.f32 %v463_v37  ;;  %1534 = vmatprep.subr.bf16.mxu1 %v2025_v15 }
 0x117   :  { %1535 = vmatpush3.bf16.msra.mxu1 %v1719_v3  ;;  %v1415_v3 = vld [vmem:[%s2413_s25] ss:$0 sm:$0xff] }
 0x118   :  { %1536 = vmatprep.subr.bf16.mxu1 %v2025_v15 }
 0x11b   :  { %1537 = vmatpush3.bf16.msra.mxu1 %v1720_v4 }
 0x11c   :  { %1538 = vmatprep.subr.bf16.mxu1 %v2025_v15 }
 0x11f   :  { %1539 = vmatpush3.bf16.msra.mxu1 %v1721_v5  ;;  %v1416_v5 = vld [vmem:[%s2374_s12] ss:$0 sm:$0xff] }
 0x120   :  { %1540 = vmatprep.subr.bf16.mxu1 %v2025_v15 }
 0x121   :  { %v1764_v39 = vpop.eup %1763 }
 0x122   :  { %v465_v41 = vmul.f32 %v1764_v39, %v462_v38 }
 0x123   :  { %1541 = vmatpush3.bf16.msra.mxu1 %v1722_v6 }
 0x124   :  { %v472_v43 = vmul.f32 %v1391_v40, %v465_v41  ;;  %1566 = vmatprep.subr.bf16.mxu1 %v2025_v15  ;;  %v1406_v41 = vld [vmem:[%s2412_s0] ss:$0 sm:$0xff] }
 0x126   :  { %v479_v44 = vadd.f32 %v1392_v42, %v472_v43  ;;  %1543 = vmatmul.mubr.bf16.vlgmr.msra.gmra.mxu1 %v2221_v22 }
 0x127   :  { %1567 = vmatpush3.bf16.msra.mxu1 %v1723_v7  ;;  %1582 = vmatprep.mubr.msk.bf16.mxu1 %vm2026_vm0, %v2025_v15 }
 0x128   :  { %v1393_v45 = vmul.f32 -1.442695, %v479_v44  ;;  %1568 = vmatprep.subr.bf16.mxu1 %v2025_v15 }
 0x12a   :  { %1765 = vpow2.f32 %v1393_v45 }
 0x12b   :  { %1569 = vmatpush3.bf16.msra.mxu1 %v1724_v8 }
 0x12c   :  { %1570 = vmatprep.subr.bf16.mxu1 %v2025_v15 }
 0x12f   :  { %1571 = vmatpush3.bf16.msra.mxu1 %v1725_v9 }
 0x130   :  { %1572 = vmatprep.subr.bf16.mxu1 %v2025_v15 }
 0x133   :  { %1573 = vmatpush3.bf16.msra.mxu1 %v1726_v10 }
 0x134   :  { %1574 = vmatprep.subr.bf16.mxu1 %v2025_v15 }
 0x137   :  { %v1766_v46 = vpop.eup %1765  ;;  %1575 = vmatpush3.bf16.msra.mxu1 %v1727_v11 }
 0x138   :  { %v483_v47 = vadd.f32 1.0, %v1766_v46  ;;  %1576 = vmatprep.subr.bf16.mxu1 %v2025_v15 }
 0x13a   :  { %1767 = vrcp.f32 %v483_v47 }
 0x13b   :  { %1577 = vmatpush3.bf16.msra.mxu1 %v1728_v12 }
 0x13c   :  { %1578 = vmatprep.subr.bf16.mxu1 %v2025_v15 }
 0x13f   :  { %1579 = vmatpush3.bf16.msra.mxu1 %v1729_v13 }
 0x140   :  { %1580 = vmatprep.subr.bf16.mxu1 %v2025_v15 }
 0x143   :  { %1581 = vmatpush3.bf16.msra.mxu1 %v1730_v14 }
 0x144   :  { %1606 = vmatprep.subr.bf16.mxu1 %v2025_v15 }
 0x147   :  { %v1768_v48 = vpop.eup %1767 }
 0x148   :  { %v486_v49 = vmul.f32 %v1768_v48, %v479_v44  ;;  %v1731_v48 = vld [vmem:[#allocation11 + $0x38] sm:$0xff]  }
 0x14a   :  { %v487_v50 = vpack.c.bf16 %v486_v49, %v486_v49  ;;  %v1732_v49 = vld [vmem:[#allocation11 + $0x30] sm:$0xff]  }
 0x14c   :  { %1563 = vmatmul.mubr.bf16.vlgmr.msra.gmra.mxu0 %v487_v50  ;;  %v1733_v50 = vld [vmem:[#allocation11 + $0x28] sm:$0xff]  }
 0x14d   :  { %1602 = vmatprep.mubr.msk.bf16.mxu0 %vm2026_vm0, %v2025_v15  ;;  %1587 = vmatpush3.bf16.msra.mxu0 %v1731_v48 }
 0x14e   :  { %1588 = vmatprep.subr.bf16.mxu0 %v2025_v15 }
 0x151   :  { %1589 = vmatpush3.bf16.msra.mxu0 %v1732_v49 }
 0x152   :  { %1590 = vmatprep.subr.bf16.mxu0 %v2025_v15 }
 0x155   :  { %1591 = vmatpush3.bf16.msra.mxu0 %v1733_v50 }
 0x156   :  { %1592 = vmatprep.subr.bf16.mxu0 %v2025_v15 }
 0x15e   :  { %v403_v51 = vpop.f32.mrf.mxu0 }
 0x160   :  { %v2244_v52 = vpop.f32.mrf.mxu0 }
 0x162   :  { %v407_v53 = vpop.f32.mrf.mxu0 }
 0x163   :  { %v1735_v53 = vld [vmem:[#allocation11 + $0x18] sm:$0xff]  }
 0x164   :  { %v408_v54 = vpop.f32.mrf.mxu0 }
 0x165   :  { %v1736_v54 = vld [vmem:[#allocation11 + $0x10] sm:$0xff]  }
 0x1e6   :  { %v2282_v37 = vpop.f32.mrf.mxu1 }
 0x1e8   :  { %v1544_v38 = vpop.f32.mrf.mxu1 }
 0x1ea   :  { %v447_v39 = vpop.f32.mrf.mxu1 }
 0x1ec   :  { %v1545_v40 = vpop.f32.mrf.mxu1 }
 0x20c   :  { %v586_v55 = vpop.f32.mrf.mxu0 }
 0x20d   :  { %v587_v57 = vadd.f32 %v586_v55, %v403_v51  ;;  %v1734_v51 = vld [vmem:[#allocation11 + $0x20] sm:$0xff]   ;;  %v1737_v55 = vld [vmem:[#allocation11 + $0x8] sm:$0xff]  }
 0x20e   :  { %v1564_v58 = vpop.f32.mrf.mxu0  ;;  %1593 = vmatpush3.bf16.msra.mxu0 %v1734_v51 }
 0x20f   :  { %v2249_v59 = vadd.f32 %v1402_v56, %v587_v57  ;;  %1594 = vmatprep.subr.bf16.mxu0 %v2025_v15  ;;  %v1738_v56 = vld [vmem:[#allocation11] sm:$0xff]  }
 0x210   :  { %v589_v60 = vpop.f32.mrf.mxu0 }
 0x211   :  { %602 = vadd.xlane.f32.xlu1 %v2249_v59  ;;  %v604_v62 = vmul.f32 %v2249_v59, %v2249_v59 }
 0x212   :  { %v1565_v61 = vpop.f32.mrf.mxu0  ;;  %1595 = vmatpush3.bf16.msra.mxu0 %v1735_v53  ;;  %v1430_v53 = vld [vmem:[%s2380_s18] ss:$0 sm:$0xff] }
 0x213   :  { %1596 = vmatprep.subr.bf16.mxu0 %v2025_v15 }
 0x215   :  { %605 = vadd.xlane.f32.xlu1 %v604_v62 }
 0x216   :  { %1597 = vmatpush3.bf16.msra.mxu0 %v1736_v54 }
 0x217   :  { %1598 = vmatprep.subr.bf16.mxu0 %v2025_v15 }
 0x21a   :  { %1599 = vmatpush3.bf16.msra.mxu0 %v1737_v55 }
 0x21b   :  { %1600 = vmatprep.subr.bf16.mxu0 %v2025_v15 }
 0x21e   :  { %1601 = vmatpush3.bf16.msra.mxu0 %v1738_v56 }
 0x21f   :  { %1626 = vmatprep.subr.bf16.mxu0 %v2025_v15 }
 0x29a   :  { %v603_v16 = vpop.xlane.xlu1 %602 }
 0x29b   :  { %v607_v17 = vmul.f32 0.03125, %v603_v16  ;;  %v1426_v16 = vld [vmem:[%s2376_s14] ss:$0 sm:$0xff] }
 0x29d   :  { %v609_v19 = vmul.f32 %v607_v17, %v607_v17  ;;  %v612_v24 = vsub.f32 %v2249_v59, %v607_v17 }
 0x29e   :  { %v606_v18 = vpop.xlane.xlu1 %605 }
 0x29f   :  { %v608_v20 = vmul.f32 0.03125, %v606_v18 }
 0x2a1   :  { %v610_v21 = vsub.f32 %v608_v20, %v609_v19 }
 0x2a3   :  { %v611_v22 = vmax.f32 %v610_v21, 0.0 }
 0x2a5   :  { %v613_v23 = vadd.f32 1e-05, %v611_v22 }
 0x2a7   :  { %1769 = vrsqrt.f32 %v613_v23  ;;  %v1739_v23 = vld [vmem:[#allocation13 + $0x38] sm:$0xff]  }
 0x2b4   :  { %v1770_v25 = vpop.eup %1769 }
 0x2b5   :  { %v615_v27 = vmul.f32 %v1770_v25, %v612_v24  ;;  %v1740_v24 = vld [vmem:[#allocation13 + $0x30] sm:$0xff]   ;;  %v1741_v25 = vld [vmem:[#allocation13 + $0x28] sm:$0xff]  }
 0x2b7   :  { %v622_v29 = vmul.f32 %v1403_v26, %v615_v27  ;;  %v1742_v26 = vld [vmem:[#allocation13 + $0x20] sm:$0xff]   ;;  %v1744_v27 = vld [vmem:[#allocation13 + $0x10] sm:$0xff]  }
 0x2b9   :  { %v629_v30 = vadd.f32 %v1404_v28, %v622_v29  ;;  %v1745_v28 = vld [vmem:[#allocation13 + $0x8] sm:$0xff]   ;;  %v1746_v29 = vld [vmem:[#allocation13] sm:$0xff]  }
 0x2bb   :  { %v1405_v31 = vmul.f32 -1.442695, %v629_v30 }
 0x2bd   :  { %1771 = vpow2.f32 %v1405_v31 }
 0x2ca   :  { %v1772_v32 = vpop.eup %1771 }
 0x2cb   :  { %v633_v33 = vadd.f32 1.0, %v1772_v32 }
 0x2cd   :  { %1773 = vrcp.f32 %v633_v33 }
 0x2da   :  { %v1774_v34 = vpop.eup %1773 }
 0x2db   :  { %v636_v35 = vmul.f32 %v1774_v34, %v629_v30 }
 0x2dd   :  { %v637_v36 = vpack.c.bf16 %v636_v35, %v636_v35 }
 0x2df   :  { %1583 = vmatmul.mubr.bf16.vlgmr.msra.gmra.mxu1 %v637_v36 }
 0x2e0   :  { %1622 = vmatprep.mubr.msk.bf16.mxu1 %vm2026_vm0, %v2025_v15  ;;  %1607 = vmatpush3.bf16.msra.mxu1 %v1739_v23 }
 0x2e1   :  { %1608 = vmatprep.subr.bf16.mxu1 %v2025_v15 }
 0x2e4   :  { %1609 = vmatpush3.bf16.msra.mxu1 %v1740_v24 }
 0x2e5   :  { %1610 = vmatprep.subr.bf16.mxu1 %v2025_v15 }
 0x2e8   :  { %1611 = vmatpush3.bf16.msra.mxu1 %v1741_v25 }
 0x2e9   :  { %1612 = vmatprep.subr.bf16.mxu1 %v2025_v15 }
 0x2ec   :  { %1613 = vmatpush3.bf16.msra.mxu1 %v1742_v26 }
 0x2ed   :  { %1614 = vmatprep.subr.bf16.mxu1 %v2025_v15 }
 0x39f   :  { %v743_v42 = vpop.f32.mrf.mxu1 }
 0x3a0   :  { %v744_v43 = vadd.f32 %v1406_v41, %v743_v42  ;;  %v1427_v41 = vld [vmem:[%s2377_s15] ss:$0 sm:$0xff] }
 0x3a1   :  { %v1584_v44 = vpop.f32.mrf.mxu1 }
 0x3a2   :  { %751 = vadd.xlane.f32.xlu0 %v744_v43  ;;  %v753_v45 = vmul.f32 %v744_v43, %v744_v43 }
 0x3a3   :  { %v746_v46 = vpop.f32.mrf.mxu1 }
 0x3a4   :  { %754 = vadd.xlane.f32.xlu1 %v753_v45 }
 0x3a5   :  { %v1585_v47 = vpop.f32.mrf.mxu1 }
 0x42b   :  { %v752_v57 = vpop.xlane.xlu0 %751 }
 0x42c   :  { %v756_v58 = vmul.f32 0.03125, %v752_v57 }
 0x42d   :  { %v755_v59 = vpop.xlane.xlu1 %754 }
 0x42e   :  { %v758_v60 = vmul.f32 %v756_v58, %v756_v58  ;;  %v757_v61 = vmul.f32 0.03125, %v755_v59  ;;  %v761_v1 = vsub.f32 %v744_v43, %v756_v58  ;;  %v1428_v43 = vld [vmem:[%s2378_s16] ss:$0 sm:$0xff] }
 0x430   :  { %v759_v62 = vsub.f32 %v757_v61, %v758_v60  ;;  %v1747_v60 = vld [vmem:[#allocation14 + $0x38] sm:$0xff]   ;;  %v1748_v61 = vld [vmem:[#allocation14 + $0x30] sm:$0xff]  }
 0x432   :  { %v760_v63 = vmax.f32 %v759_v62, 0.0  ;;  %v1749_v62 = vld [vmem:[#allocation14 + $0x28] sm:$0xff]  }
 0x434   :  { %v762_v0 = vadd.f32 1e-05, %v760_v63  ;;  %v1750_v63 = vld [vmem:[#allocation14 + $0x20] sm:$0xff]  }
 0x436   :  { %1775 = vrsqrt.f32 %v762_v0  ;;  %v1751_v0 = vld [vmem:[#allocation14 + $0x18] sm:$0xff]  }
 0x443   :  { %v1776_v2 = vpop.eup %1775 }
 0x444   :  { %v764_v4 = vmul.f32 %v1776_v2, %v761_v1  ;;  %v1752_v1 = vld [vmem:[#allocation14 + $0x10] sm:$0xff]   ;;  %v1753_v2 = vld [vmem:[#allocation14 + $0x8] sm:$0xff]  }
 0x446   :  { %v771_v6 = vmul.f32 %v1415_v3, %v764_v4  ;;  %v1754_v3 = vld [vmem:[#allocation14] sm:$0xff]  }
 0x448   :  { %v778_v7 = vadd.f32 %v1416_v5, %v771_v6 }
 0x44a   :  { %v1417_v8 = vmul.f32 -1.442695, %v778_v7 }
 0x44c   :  { %1777 = vpow2.f32 %v1417_v8 }
 0x459   :  { %v1778_v9 = vpop.eup %1777 }
 0x45a   :  { %v782_v10 = vadd.f32 1.0, %v1778_v9 }
 0x45c   :  { %1779 = vrcp.f32 %v782_v10 }
 0x469   :  { %v1780_v11 = vpop.eup %1779 }
 0x46a   :  { %v785_v12 = vmul.f32 %v1780_v11, %v778_v7 }
 0x46c   :  { %v786_v13 = vpack.c.bf16 %v785_v12, %v785_v12 }
 0x46e   :  { %1603 = vmatmul.mubr.bf16.vlgmr.msra.gmra.mxu0 %v786_v13 }
 0x46f   :  { %1642 = vmatprep.mubr.msk.bf16.mxu0 %vm2026_vm0, %v2025_v15  ;;  %1627 = vmatpush3.bf16.msra.mxu0 %v1747_v60 }
 0x470   :  { %1628 = vmatprep.subr.bf16.mxu0 %v2025_v15 }
 0x473   :  { %1629 = vmatpush3.bf16.msra.mxu0 %v1748_v61 }
 0x474   :  { %1630 = vmatprep.subr.bf16.mxu0 %v2025_v15 }
 0x477   :  { %1631 = vmatpush3.bf16.msra.mxu0 %v1749_v62  ;;  %v1454_v62 = vld [vmem:[%s2388_s26] ss:$0 sm:$0xff] }
 0x478   :  { %1632 = vmatprep.subr.bf16.mxu0 %v2025_v15 }
 0x47b   :  { %1633 = vmatpush3.bf16.msra.mxu0 %v1750_v63 }
 0x47c   :  { %1634 = vmatprep.subr.bf16.mxu0 %v2025_v15 }
 0x47f   :  { %1635 = vmatpush3.bf16.msra.mxu0 %v1751_v0 }
 0x480   :  { %1636 = vmatprep.subr.bf16.mxu0 %v2025_v15 }
 0x483   :  { %1637 = vmatpush3.bf16.msra.mxu0 %v1752_v1 }
 0x484   :  { %1638 = vmatprep.subr.bf16.mxu0 %v2025_v15 }
 0x487   :  { %1639 = vmatpush3.bf16.msra.mxu0 %v1753_v2 }
 0x488   :  { %1640 = vmatprep.subr.bf16.mxu0 %v2025_v15 }
 0x48b   :  { %1641 = vmatpush3.bf16.msra.mxu0 %v1754_v3 }
 0x52e   :  { %v885_v14 = vpop.f32.mrf.mxu0 }
 0x52f   :  { %v886_v17 = vadd.f32 %v885_v14, %v2244_v52  ;;  %v1743_v52 = vld [vmem:[#allocation13 + $0x18] sm:$0xff]   ;;  %v1439_v14 = vld [vmem:[%s2381_s19] ss:$0 sm:$0xff] }
 0x530   :  { %v1604_v18 = vpop.f32.mrf.mxu0  ;;  %1615 = vmatpush3.bf16.msra.mxu1 %v1743_v52  ;;  %v1450_v52 = vld [vmem:[%s2384_s22] ss:$0 sm:$0xff] }
 0x531   :  { %v898_v19 = vadd.f32 %v1426_v16, %v886_v17  ;;  %1616 = vmatprep.subr.bf16.mxu1 %v2025_v15  ;;  %v1440_v17 = vld [vmem:[%s2382_s20] ss:$0 sm:$0xff] }
 0x532   :  { %v888_v20 = vpop.f32.mrf.mxu0 }
 0x533   :  { %901 = vadd.xlane.f32.xlu0 %v898_v19  ;;  %v903_v21 = vmul.f32 %v898_v19, %v898_v19 }
 0x534   :  { %v1605_v22 = vpop.f32.mrf.mxu0  ;;  %1617 = vmatpush3.bf16.msra.mxu1 %v1744_v27 }
 0x535   :  { %904 = vadd.xlane.f32.xlu1 %v903_v21  ;;  %1618 = vmatprep.subr.bf16.mxu1 %v2025_v15 }
 0x538   :  { %1619 = vmatpush3.bf16.msra.mxu1 %v1745_v28 }
 0x539   :  { %1620 = vmatprep.subr.bf16.mxu1 %v2025_v15 }
 0x53c   :  { %1621 = vmatpush3.bf16.msra.mxu1 %v1746_v29 }
 0x53d   :  { %1646 = vmatprep.subr.bf16.mxu1 %v2025_v15 }
 0x5bc   :  { %v902_v30 = vpop.xlane.xlu0 %901 }
 0x5bd   :  { %v906_v31 = vmul.f32 0.03125, %v902_v30 }
 0x5be   :  { %v905_v32 = vpop.xlane.xlu1 %904 }
 0x5bf   :  { %v908_v33 = vmul.f32 %v906_v31, %v906_v31  ;;  %v907_v34 = vmul.f32 0.03125, %v905_v32  ;;  %v911_v39 = vsub.f32 %v898_v19, %v906_v31 }
 0x5c1   :  { %v909_v35 = vsub.f32 %v907_v34, %v908_v33  ;;  %v1755_v33 = vld [vmem:[#allocation16 + $0x38] sm:$0xff]   ;;  %v1756_v34 = vld [vmem:[#allocation16 + $0x30] sm:$0xff]  }
 0x5c3   :  { %v910_v36 = vmax.f32 %v909_v35, 0.0  ;;  %v1757_v35 = vld [vmem:[#allocation16 + $0x28] sm:$0xff]  }
 0x5c5   :  { %v912_v38 = vadd.f32 1e-05, %v910_v36  ;;  %v1758_v36 = vld [vmem:[#allocation16 + $0x20] sm:$0xff]  }
 0x5c7   :  { %1781 = vrsqrt.f32 %v912_v38  ;;  %v1760_v38 = vld [vmem:[#allocation16 + $0x10] sm:$0xff]  }
 0x5d4   :  { %v1782_v40 = vpop.eup %1781 }
 0x5d5   :  { %v914_v42 = vmul.f32 %v1782_v40, %v911_v39  ;;  %v1761_v39 = vld [vmem:[#allocation16 + $0x8] sm:$0xff]   ;;  %v1762_v40 = vld [vmem:[#allocation16] sm:$0xff]  }
 0x5d7   :  { %v921_v44 = vmul.f32 %v1427_v41, %v914_v42 }
 0x5d9   :  { %v928_v45 = vadd.f32 %v1428_v43, %v921_v44 }
 0x5db   :  { %v1429_v46 = vmul.f32 -1.442695, %v928_v45 }
 0x5dd   :  { %1783 = vpow2.f32 %v1429_v46 }
 0x5ea   :  { %v1784_v47 = vpop.eup %1783 }
 0x5eb   :  { %v932_v48 = vadd.f32 1.0, %v1784_v47 }
 0x5ed   :  { %1785 = vrcp.f32 %v932_v48 }
 0x5fa   :  { %v1786_v49 = vpop.eup %1785 }
 0x5fb   :  { %v935_v50 = vmul.f32 %v1786_v49, %v928_v45 }
 0x5fd   :  { %v936_v51 = vpack.c.bf16 %v935_v50, %v935_v50 }
 0x5ff   :  { %1623 = vmatmul.mubr.bf16.vlgmr.msra.gmra.mxu1 %v936_v51  ;;  %v1451_v51 = vld [vmem:[%s2385_s23] ss:$0 sm:$0xff]  ;;  %s2027_s23 = smov [#allocation17]  }
 0x600   :  { %1662 = vmatprep.mubr.msk.bf16.mxu1 %vm2026_vm0, %v2025_v15  ;;  %1647 = vmatpush3.bf16.msra.mxu1 %v1755_v33  ;;  %s1354_s30 = sshll.u32 %s2027_s23, 4  ;;  %s1355_s30 = int_to_ptr.vmem [resolvable:$true] %s1354_s30 }
 0x601   :  { %1648 = vmatprep.subr.bf16.mxu1 %v2025_v15  ;;  %p1984_p4 = scmp.lt.s32.totalorder %s1355_s30, %s1355_s30 }
 0x604   :  { %1649 = vmatpush3.bf16.msra.mxu1 %v1756_v34 }
 0x605   :  { %1650 = vmatprep.subr.bf16.mxu1 %v2025_v15 }
 0x608   :  { %1651 = vmatpush3.bf16.msra.mxu1 %v1757_v35 }
 0x609   :  { %1652 = vmatprep.subr.bf16.mxu1 %v2025_v15 }
 0x60c   :  { %1653 = vmatpush3.bf16.msra.mxu1 %v1758_v36 }
 0x60d   :  { %1654 = vmatprep.subr.bf16.mxu1 %v2025_v15 }
 0x6bf   :  { %v1042_v54 = vpop.f32.mrf.mxu1 }
 0x6c0   :  { %v1043_v55 = vadd.f32 %v1430_v53, %v1042_v54 }
 0x6c1   :  { %v1624_v56 = vpop.f32.mrf.mxu1 }
 0x6c2   :  { %1050 = vadd.xlane.f32.xlu0 %v1043_v55  ;;  %v1052_v57 = vmul.f32 %v1043_v55, %v1043_v55 }
 0x6c3   :  { %v1045_v58 = vpop.f32.mrf.mxu1 }
 0x6c4   :  { %1053 = vadd.xlane.f32.xlu1 %v1052_v57 }
 0x6c5   :  { %v1625_v59 = vpop.f32.mrf.mxu1 }
 0x74b   :  { %v1051_v4 = vpop.xlane.xlu0 %1050 }
 0x74c   :  { %v1055_v5 = vmul.f32 0.03125, %v1051_v4 }
 0x74d   :  { %v1054_v6 = vpop.xlane.xlu1 %1053 }
 0x74e   :  { %v1057_v7 = vmul.f32 %v1055_v5, %v1055_v5  ;;  %v1056_v8 = vmul.f32 0.03125, %v1054_v6  ;;  %v1060_v12 = vsub.f32 %v1043_v55, %v1055_v5 }
 0x750   :  { %v1058_v9 = vsub.f32 %v1056_v8, %v1057_v7 }
 0x752   :  { %v1059_v10 = vmax.f32 %v1058_v9, 0.0 }
 0x754   :  { %v1061_v11 = vadd.f32 1e-05, %v1059_v10 }
 0x756   :  { %1787 = vrsqrt.f32 %v1061_v11 }
 0x763   :  { %v1788_v13 = vpop.eup %1787 }
 0x764   :  { %v1063_v16 = vmul.f32 %v1788_v13, %v1060_v12 }
 0x766   :  { %v1070_v18 = vmul.f32 %v1439_v14, %v1063_v16 }
 0x768   :  { %v1077_v19 = vadd.f32 %v1440_v17, %v1070_v18 }
 0x76a   :  { %v1441_v20 = vmul.f32 -1.442695, %v1077_v19 }
 0x76c   :  { %1789 = vpow2.f32 %v1441_v20 }
 0x779   :  { %v1790_v21 = vpop.eup %1789 }
 0x77a   :  { %v1081_v22 = vadd.f32 1.0, %v1790_v21 }
 0x77c   :  { %1791 = vrcp.f32 %v1081_v22 }
 0x789   :  { %v1792_v23 = vpop.eup %1791 }
 0x78a   :  { %v1084_v24 = vmul.f32 %v1792_v23, %v1077_v19 }
 0x78c   :  { %v1085_v25 = vpack.c.bf16 %v1084_v24, %v1084_v24 }
 0x78e   :  { %1643 = vmatmul.mubr.bf16.vlgmr.msra.gmra.mxu0 %v1085_v25 }
 0x84e   :  { %v1184_v26 = vpop.f32.mrf.mxu0 }
 0x84f   :  { %v1185_v27 = vadd.f32 %v1184_v26, %v2282_v37  ;;  %v1759_v37 = vld [vmem:[#allocation16 + $0x18] sm:$0xff]  }
 0x850   :  { %v1644_v28 = vpop.f32.mrf.mxu0  ;;  %1655 = vmatpush3.bf16.msra.mxu1 %v1759_v37 }
 0x851   :  { %v1197_v29 = vadd.f32 %v1450_v52, %v1185_v27  ;;  %1656 = vmatprep.subr.bf16.mxu1 %v2025_v15 }
 0x852   :  { %v1187_v30 = vpop.f32.mrf.mxu0 }
 0x853   :  { %1200 = vadd.xlane.f32.xlu0 %v1197_v29  ;;  %v1202_v31 = vmul.f32 %v1197_v29, %v1197_v29 }
 0x854   :  { %v1645_v32 = vpop.f32.mrf.mxu0  ;;  %1657 = vmatpush3.bf16.msra.mxu1 %v1760_v38 }
 0x855   :  { %1203 = vadd.xlane.f32.xlu1 %v1202_v31  ;;  %1658 = vmatprep.subr.bf16.mxu1 %v2025_v15 }
 0x858   :  { %1659 = vmatpush3.bf16.msra.mxu1 %v1761_v39 }
 0x859   :  { %1660 = vmatprep.subr.bf16.mxu1 %v2025_v15  ;;  %v1452_v15 = vld [vmem:[%s2386_s24] ss:$0 sm:$0xff]  ;;  %s1979_s24 = scalar_lea.vmem %s1355_s30, 128 }
 0x85a   :  { %p1980_p3 = scmp.ne.s32.totalorder %s1355_s30, %s1979_s24  ;;  %p1985_p5 = scmp.lt.s32.totalorder %s1979_s24, %s1979_s24 }
 0x85c   :  { %1661 = vmatpush3.bf16.msra.mxu1 %v1762_v40  ;;  %p1986_p6 = por %p1985_p5, %p1984_p4 }
 0x85e   :  { %p1987_p7 = pnand %p1986_p6, %p1980_p3 }
 0x8dc   :  { %v1201_v41 = vpop.xlane.xlu0 %1200 }
 0x8dd   :  { %v1205_v42 = vmul.f32 0.015625, %v1201_v41 }
 0x8de   :  { %v1204_v43 = vpop.xlane.xlu1 %1203 }
 0x8df   :  { %v1207_v44 = vmul.f32 %v1205_v42, %v1205_v42  ;;  %v1206_v45 = vmul.f32 0.015625, %v1204_v43  ;;  %v1210_v49 = vsub.f32 %v1197_v29, %v1205_v42 }
 0x8e1   :  { %v1208_v46 = vsub.f32 %v1206_v45, %v1207_v44 }
 0x8e3   :  { %v1209_v47 = vmax.f32 %v1208_v46, 0.0 }
 0x8e5   :  { %v1211_v48 = vadd.f32 1e-05, %v1209_v47 }
 0x8e7   :  { %1793 = vrsqrt.f32 %v1211_v48 }
 0x8f4   :  { %v1794_v50 = vpop.eup %1793 }
 0x8f5   :  { %v1213_v53 = vmul.f32 %v1794_v50, %v1210_v49 }
 0x8f7   :  { %v1220_v54 = vmul.f32 %v1451_v51, %v1213_v53 }
 0x8f9   :  { %v1227_v55 = vadd.f32 %v1452_v15, %v1220_v54 }
 0x8fb   :  { %v1453_v56 = vmul.f32 -1.442695, %v1227_v55 }
 0x8fd   :  { %1795 = vpow2.f32 %v1453_v56 }
 0x90a   :  { %v1796_v57 = vpop.eup %1795 }
 0x90b   :  { %v1231_v58 = vadd.f32 1.0, %v1796_v57 }
 0x90d   :  { %1797 = vrcp.f32 %v1231_v58 }
 0x91a   :  { %v1798_v59 = vpop.eup %1797 }
 0x91b   :  { %v1234_v60 = vmul.f32 %v1798_v59, %v1227_v55 }
 0x91d   :  { %v1235_v61 = vpack.c.bf16 %v1234_v60, %v1234_v60 }
 0x91f   :  { %1663 = vmatmul.mubr.bf16.vlgmr.msra.gmra.mxu1 %v1235_v61 }
 0x9df   :  { %v1341_v63 = vpop.f32.mrf.mxu1 }
 0x9e0   :  { %v1342_v0 = vadd.f32 %v1454_v62, %v1341_v63 }
 0x9e1   :  { %v1664_v1 = vpop.f32.mrf.mxu1 }
 0x9e2   :  { %1347 = vst [vmem:[#allocation17] sm:$0xff] %v1342_v0 }
 0x9e3   :  { %v1344_v2 = vpop.f32.mrf.mxu1 }
 0x9e4   :  { %1990 = shalt.err (!%p1987_p7)
}
 0x9e5   :  { %1357 = dma.vmem_to_hbm [thread:$0]  %s1355_s30, 128, %s2389_s27, [#allocation4]   ;;  %v1665_v3 = vpop.f32.mrf.mxu1 }
 0x9e6   :  { %2009 = dma.done.wait [#allocation4], 128  }
 0x9e7   :  { %2010 = vsyncadd [#allocation4], 4294967168 }
 0x9e8   :  { %1361 = vsyncpa [#allocation3], 1 }
 0x9e9   :  { %1362 = vsyncpa [#allocation6], 1 }
 0x9ea   :  { %1363 = vsyncpa [#allocation9], 1 }
 0x9eb   :  { %1364 = vsyncpa [#allocation12], 1 }
 0x9ec   :  { %1365 = vsyncpa [#allocation15], 1 }
 0x9ed   :  { %1366 = vsyncpa [#allocation4], 1 }

</bundles_post_ra>
